<compile_context>
chip_gen: v5e
topology: v5e:2x2
jax: 0.10.0
libtpu: 0.0.40
codegen_flags: <defaults>
</compile_context>

<pallas_src>
import functools

import jax
import jax.numpy as jnp
from jax.experimental import pallas as pl
from jax.experimental.pallas import tpu as pltpu


_VMEM_LIMIT_BYTES = 48 * 1024 * 1024   # explicit scoped-VMEM budget (< 64 MiB v7x)


def _compiler_params():
    return pltpu.CompilerParams(
        dimension_semantics=("parallel",),          # batch axis -> megacore shard
        vmem_limit_bytes=_VMEM_LIMIT_BYTES,
    )


# ----------------------------------------------------------------------------
# In-kernel math helpers (traced inside the Pallas kernels)
# ----------------------------------------------------------------------------
def _layernorm(x, gamma, beta, eps=1e-5):
    # torch.nn.LayerNorm over last dim, biased variance.  Kept in f32.
    mean = jnp.mean(x, axis=-1, keepdims=True)
    var = jnp.mean((x - mean) ** 2, axis=-1, keepdims=True)
    return (x - mean) * jax.lax.rsqrt(var + eps) * gamma + beta


def _gelu_tanh(x):
    # tanh-form GELU: routes transcendental work to the EUP slot.
    # TODO(synk): torch F.gelu default is exact erf; tanh form differs by <~1e-3.
    c = 0.7978845608028654  # sqrt(2/pi)
    return 0.5 * x * (1.0 + jnp.tanh(c * (x + 0.044715 * x * x * x)))


# ----------------------------------------------------------------------------
# Kernel 1: patch embedding  (conv-as-matmul + cls token + position embedding)
# ----------------------------------------------------------------------------
def _patch_embed_kernel(p_ref, w_ref, b_ref, cls_ref, pos_ref, o_ref):
    # p_ref: (Np, C*p*p) bf16, w_ref: (C*p*p, E) bf16,
    # b_ref/cls_ref: (1, E) f32, pos_ref: (Np+1, E) f32.
    proj = jnp.dot(p_ref[...], w_ref[...],
                   preferred_element_type=jnp.float32) + b_ref[...]
    # Single aligned full-block store (no sublane-shifted partial writes).
    o_ref[...] = jnp.concatenate([cls_ref[...], proj], axis=0) + pos_ref[...]


def patch_embed(patches_bf16, w_flat_bf16, bias, cls_tok, pos):
    B, Np, P = patches_bf16.shape
    E = w_flat_bf16.shape[1]
    S = Np + 1
    return pl.pallas_call(
        _patch_embed_kernel,
        out_shape=jax.ShapeDtypeStruct((B, S, E), jnp.float32),
        grid=(B,),
        in_specs=[
            pl.BlockSpec((pl.Squeezed(), Np, P), lambda b: (b, 0, 0)),
            pl.BlockSpec((P, E), lambda b: (0, 0)),
            pl.BlockSpec((1, E), lambda b: (0, 0)),
            pl.BlockSpec((1, E), lambda b: (0, 0)),
            pl.BlockSpec((S, E), lambda b: (0, 0)),
        ],
        out_specs=pl.BlockSpec((pl.Squeezed(), S, E), lambda b: (b, 0, 0)),
        compiler_params=_compiler_params(),
    )(patches_bf16, w_flat_bf16, bias, cls_tok, pos)


# ----------------------------------------------------------------------------
# Kernel 2: one transformer encoder block (MHA + MLP + 2x LayerNorm, residuals)
# ----------------------------------------------------------------------------
def _encoder_kernel(x_ref, wqkv_ref, bqkv_ref, wo3_ref, bo_ref,
                    g1_ref, be1_ref, w1_ref, b1_ref, w2_ref, b2_ref,
                    g2_ref, be2_ref, o_ref, *, num_heads, head_dim):
    x = x_ref[...]                                    # (S, E) f32 residual stream
    E = num_heads * head_dim
    hd = head_dim
    scale = 1.0 / float(head_dim) ** 0.5
    bf16 = jnp.bfloat16

    # ---- fused QKV projection: one (S,E)x(E,3E) bf16 MXU matmul, f32 acc ----
    qkv = jnp.dot(x.astype(bf16), wqkv_ref[...],
                  preferred_element_type=jnp.float32) + bqkv_ref[...]   # (S, 3E)
    q = qkv[:, 0 * E:1 * E] * scale
    k = qkv[:, 1 * E:2 * E]
    v = qkv[:, 2 * E:3 * E]

    # Split heads into a leading batch dim -> single batched contractions
    # (instead of num_heads small unrolled matmuls + lane concatenate).
    def split_heads(t):
        return jnp.stack([t[:, h * hd:(h + 1) * hd] for h in range(num_heads)],
                         axis=0)                       # (H, S, hd)
    qh = split_heads(q).astype(bf16)
    kh = split_heads(k).astype(bf16)
    vh = split_heads(v).astype(bf16)

    s = jnp.einsum('hqd,hkd->hqk', qh, kh,
                   preferred_element_type=jnp.float32)                  # (H, S, S)
    s = s - jnp.max(s, axis=-1, keepdims=True)
    p = jnp.exp(s)
    # reciprocal on EUP instead of a VALU divide over the (H,S,S) tensor.
    p = p * pl.reciprocal(jnp.sum(p, axis=-1, keepdims=True), approx=True)
    ctx = jnp.einsum('hqk,hkd->hqd', p.astype(bf16), vh,
                     preferred_element_type=jnp.float32)                # (H, S, hd)

    # Output projection with head-blocked weight (H, hd, E): batched matmul +
    # head-sum == concat(heads) @ Wo, with no lane-dim concatenate.
    proj = jnp.einsum('hqd,hde->hqe', ctx.astype(bf16), wo3_ref[...],
                      preferred_element_type=jnp.float32)               # (H, S, E)
    attn = jnp.sum(proj, axis=0) + bo_ref[...]                          # (S, E)

    x = x + attn                                      # dropout1 = identity (eval)
    x = _layernorm(x, g1_ref[...], be1_ref[...])

    # ---- MLP (bf16 MXU inputs, f32 accumulate) ----
    h1 = jnp.dot(x.astype(bf16), w1_ref[...],
                 preferred_element_type=jnp.float32) + b1_ref[...]
    h1 = _gelu_tanh(h1)
    ff = jnp.dot(h1.astype(bf16), w2_ref[...],
                 preferred_element_type=jnp.float32) + b2_ref[...]

    x = x + ff                                        # dropout2 = identity (eval)
    x = _layernorm(x, g2_ref[...], be2_ref[...])
    o_ref[...] = x


def encoder_block(x, blk, *, num_heads):
    B, S, E = x.shape
    H = blk["w1"].shape[1]
    hd = E // num_heads
    kern = functools.partial(_encoder_kernel, num_heads=num_heads, head_dim=hd)

    def const_spec(shape):
        nd = len(shape)
        return pl.BlockSpec(shape, lambda b, _n=nd: (0,) * _n)

    return pl.pallas_call(
        kern,
        out_shape=jax.ShapeDtypeStruct((B, S, E), jnp.float32),
        grid=(B,),
        in_specs=[
            pl.BlockSpec((pl.Squeezed(), S, E), lambda b: (b, 0, 0)),
            const_spec((E, 3 * E)), const_spec((1, 3 * E)),
            const_spec((num_heads, hd, E)), const_spec((1, E)),
            const_spec((1, E)), const_spec((1, E)),
            const_spec((E, H)), const_spec((1, H)),
            const_spec((H, E)), const_spec((1, E)),
            const_spec((1, E)), const_spec((1, E)),
        ],
        out_specs=pl.BlockSpec((pl.Squeezed(), S, E), lambda b: (b, 0, 0)),
        compiler_params=_compiler_params(),
    )(x, blk["wqkv"], blk["bqkv"], blk["wo3"], blk["bo"],
      blk["g1"], blk["be1"], blk["w1"], blk["b1"],
      blk["w2"], blk["b2"], blk["g2"], blk["be2"])


# ----------------------------------------------------------------------------
# Kernel 3: final LayerNorm on cls tokens + classification head (batched)
# ----------------------------------------------------------------------------
def _head_kernel(cls_ref, g_ref, be_ref, wh_ref, bh_ref, o_ref):
    cls = _layernorm(cls_ref[...], g_ref[...], be_ref[...])      # (B, E) f32
    o_ref[...] = jnp.dot(cls.astype(jnp.bfloat16), wh_ref[...],
                         preferred_element_type=jnp.float32) + bh_ref[...]


def classify_head(cls_tokens, gamma, beta, wh_bf16, bh):
    B, E = cls_tokens.shape
    C = wh_bf16.shape[1]
    # One (B,E)x(E,C) matmul, no per-batch grid, no (S,E) DMA waste.
    return pl.pallas_call(
        _head_kernel,
        out_shape=jax.ShapeDtypeStruct((B, C), jnp.float32),
    )(cls_tokens, gamma, beta, wh_bf16, bh)


# ----------------------------------------------------------------------------
# Parameters (PyTorch-layout f32) + one-time device-layout preparation
# ----------------------------------------------------------------------------
def init_params(key, *, img_size, patch_size, in_channels, num_classes,
                embed_dim, depth, num_heads, mlp_ratio):
    num_patches = (img_size // patch_size) ** 2
    hidden = int(embed_dim * mlp_ratio)
    keys = iter(jax.random.split(key, 8 + depth * 8))
    nrm = lambda k, s: (0.02 * jax.random.normal(k, s)).astype(jnp.float32)

    params = {
        # Conv2d(in_channels, embed_dim, k=p, s=p): weight (E, C, p, p), bias (1, E)
        "conv_w": nrm(next(keys), (embed_dim, in_channels, patch_size, patch_size)),
        "conv_b": nrm(next(keys), (1, embed_dim)),
        "cls": nrm(next(keys), (1, embed_dim)),
        "pos": nrm(next(keys), (num_patches + 1, embed_dim)),
        "head_w": nrm(next(keys), (embed_dim, num_classes)),   # head.weight.T
        "head_b": nrm(next(keys), (1, num_classes)),
        "ln_g": jnp.ones((1, embed_dim), jnp.float32),
        "ln_b": jnp.zeros((1, embed_dim), jnp.float32),
        "blocks": [],
    }
    for _ in range(depth):
        params["blocks"].append({
            "wqkv": nrm(next(keys), (embed_dim, 3 * embed_dim)),  # in_proj_weight.T
            "bqkv": nrm(next(keys), (1, 3 * embed_dim)),
            "wo": nrm(next(keys), (embed_dim, embed_dim)),        # out_proj.weight.T
            "bo": nrm(next(keys), (1, embed_dim)),
            "w1": nrm(next(keys), (embed_dim, hidden)),           # fc1.weight.T
            "b1": nrm(next(keys), (1, hidden)),
            "w2": nrm(next(keys), (hidden, embed_dim)),           # fc2.weight.T
            "b2": nrm(next(keys), (1, embed_dim)),
            "g1": jnp.ones((1, embed_dim), jnp.float32),
            "be1": jnp.zeros((1, embed_dim), jnp.float32),
            "g2": jnp.ones((1, embed_dim), jnp.float32),
            "be2": jnp.zeros((1, embed_dim), jnp.float32),
        })
    return params


def prepare_params(params, *, num_heads):
    """One-time host glue: cast matmul weights to bf16 and pre-reshape into the
    layouts the kernels consume (biases / LN params / embeddings stay f32)."""
    E = params["conv_w"].shape[0]
    hd = E // num_heads
    dev = {
        "conv_w": params["conv_w"].reshape(E, -1).T.astype(jnp.bfloat16),  # (C*p*p, E)
        "conv_b": params["conv_b"],
        "cls": params["cls"],
        "pos": params["pos"],
        "head_w": params["head_w"].astype(jnp.bfloat16),
        "head_b": params["head_b"],
        "ln_g": params["ln_g"],
        "ln_b": params["ln_b"],
        "blocks": [],
    }
    for blk in params["blocks"]:
        dev["blocks"].append({
            "wqkv": blk["wqkv"].astype(jnp.bfloat16),
            "bqkv": blk["bqkv"],
            "wo3": blk["wo"].reshape(num_heads, hd, E).astype(jnp.bfloat16),
            "bo": blk["bo"],
            "w1": blk["w1"].astype(jnp.bfloat16),
            "b1": blk["b1"],
            "w2": blk["w2"].astype(jnp.bfloat16),
            "b2": blk["b2"],
            "g1": blk["g1"], "be1": blk["be1"],
            "g2": blk["g2"], "be2": blk["be2"],
        })
    return dev


# ----------------------------------------------------------------------------
# Full model forward
# ----------------------------------------------------------------------------
def vision_transformer_forward(x_nchw, dev_params, *, patch_size, num_heads):
    B, C, H, W = x_nchw.shape
    p = patch_size
    Hn, Wn = H // p, W // p
    Np = Hn * Wn

    # Glue: non-overlapping patch extraction (== stride-p conv im2col), NCHW order,
    # cast to bf16 for the MXU projection.
    patches = x_nchw.reshape(B, C, Hn, p, Wn, p)
    patches = patches.transpose(0, 2, 4, 1, 3, 5).reshape(B, Np, C * p * p)
    patches = patches.astype(jnp.bfloat16)

    x = patch_embed(patches, dev_params["conv_w"], dev_params["conv_b"],
                    dev_params["cls"], dev_params["pos"])
    for blk in dev_params["blocks"]:
        x = encoder_block(x, blk, num_heads=num_heads)

    cls_tokens = x[:, 0, :]                      # glue: only token 0 feeds the head
    return classify_head(cls_tokens, dev_params["ln_g"], dev_params["ln_b"],
                         dev_params["head_w"], dev_params["head_b"])


if __name__ == "__main__":
    # Small, forward-consistent configuration.
    IMG, PATCH, CIN, CLASSES = 16, 4, 4, 10
    EMBED, DEPTH, HEADS, MLP_RATIO = 32, 2, 4, 4.0
    B = 2

    key = jax.random.PRNGKey(0)
    kx, kp = jax.random.split(key)
    x = jax.random.normal(kx, (B, CIN, IMG, IMG), dtype=jnp.float32)  # NCHW input

    params = init_params(kp, img_size=IMG, patch_size=PATCH, in_channels=CIN,
                         num_classes=CLASSES, embed_dim=EMBED, depth=DEPTH,
                         num_heads=HEADS, mlp_ratio=MLP_RATIO)
    dev_params = prepare_params(params, num_heads=HEADS)

    fwd = jax.jit(functools.partial(vision_transformer_forward,
                                    patch_size=PATCH, num_heads=HEADS))
    out = jax.block_until_ready(fwd(x, dev_params))
    assert out.shape == (B, CLASSES) and out.dtype == jnp.float32
    print("KERNEL_OK")
</pallas_src>

<mosaic_0001>
module attributes {stable_mosaic.version = 11 : i64} {
  func.func @_patch_embed_kernel(%arg0: i32, %arg1: memref<1x16x64xbf16, #tpu.memory_space<vmem>>, %arg2: memref<64x32xbf16, #tpu.memory_space<vmem>>, %arg3: memref<1x32xf32, #tpu.memory_space<vmem>>, %arg4: memref<1x32xf32, #tpu.memory_space<vmem>>, %arg5: memref<17x32xf32, #tpu.memory_space<vmem>>, %arg6: memref<1x17x32xf32, #tpu.memory_space<vmem>>) attributes {dimension_semantics = [#tpu.dimension_semantics<parallel>], iteration_bounds = array<i64: 2>, scalar_prefetch = 0 : i64, scratch_operands = 0 : i64, tpu.core_type = #tpu.core_type<tc>, window_params = [{transform_indices = @transform_0, window_bounds = array<i64: 1, 16, 64>}, {pipeline_mode = #tpu.pipeline_mode<synchronous>, transform_indices = @transform_1, window_bounds = array<i64: 64, 32>}, {pipeline_mode = #tpu.pipeline_mode<synchronous>, transform_indices = @transform_2, window_bounds = array<i64: 1, 32>}, {pipeline_mode = #tpu.pipeline_mode<synchronous>, transform_indices = @transform_3, window_bounds = array<i64: 1, 32>}, {pipeline_mode = #tpu.pipeline_mode<synchronous>, transform_indices = @transform_4, window_bounds = array<i64: 17, 32>}, {transform_indices = @transform_5, window_bounds = array<i64: 1, 17, 32>}]} {
    %c0 = arith.constant 0 : index
    %c0_0 = arith.constant 0 : index
    %c0_1 = arith.constant 0 : index
    %0 = vector.load %arg1[%c0, %c0_0, %c0_1] : memref<1x16x64xbf16, #tpu.memory_space<vmem>>, vector<1x16x64xbf16>
    %1 = vector.shape_cast %0 : vector<1x16x64xbf16> to vector<16x64xbf16>
    %c0_2 = arith.constant 0 : index
    %c0_3 = arith.constant 0 : index
    %2 = vector.load %arg2[%c0_2, %c0_3] : memref<64x32xbf16, #tpu.memory_space<vmem>>, vector<64x32xbf16>
    %cst = arith.constant dense<0.000000e+00> : vector<16x32xf32>
    %3 = tpu.matmul %1, %2, %cst {dimension_numbers = #tpu.dot_dimension_numbers<[1], [0], [0], [1], [0, 0, 1, 1], [], []>} : vector<16x64xbf16>, vector<64x32xbf16>, vector<16x32xf32> -> vector<16x32xf32>
    %c0_4 = arith.constant 0 : index
    %c0_5 = arith.constant 0 : index
    %4 = vector.load %arg3[%c0_4, %c0_5] : memref<1x32xf32, #tpu.memory_space<vmem>>, vector<1x32xf32>
    %5 = vector.broadcast %4 : vector<1x32xf32> to vector<16x32xf32>
    %6 = arith.addf %3, %5 : vector<16x32xf32>
    %c0_6 = arith.constant 0 : index
    %c0_7 = arith.constant 0 : index
    %7 = vector.load %arg4[%c0_6, %c0_7] : memref<1x32xf32, #tpu.memory_space<vmem>>, vector<1x32xf32>
    %8 = tpu.concatenate %7, %6 in 0 : vector<1x32xf32>, vector<16x32xf32> -> vector<17x32xf32>
    %c0_8 = arith.constant 0 : index
    %c0_9 = arith.constant 0 : index
    %9 = vector.load %arg5[%c0_8, %c0_9] : memref<17x32xf32, #tpu.memory_space<vmem>>, vector<17x32xf32>
    %10 = arith.addf %8, %9 : vector<17x32xf32>
    %c0_10 = arith.constant 0 : index
    %c0_11 = arith.constant 0 : index
    %c0_12 = arith.constant 0 : index
    %11 = vector.load %arg6[%c0_10, %c0_11, %c0_12] : memref<1x17x32xf32, #tpu.memory_space<vmem>>, vector<1x17x32xf32>
    %12 = vector.shape_cast %11 : vector<1x17x32xf32> to vector<17x32xf32>
    %13 = vector.shape_cast %10 : vector<17x32xf32> to vector<1x17x32xf32>
    tpu.vector_store %arg6[%c0_10, %c0_11, %c0_12], %13 {strides = array<i32>} : memref<1x17x32xf32, #tpu.memory_space<vmem>>, vector<1x17x32xf32>,
    return
  }
  func.func @transform_0(%arg0: i32) -> (i32, i32, i32) {
    %c0_i32 = arith.constant 0 : i32
    %c0_i32_0 = arith.constant 0 : i32
    %c0_i32_1 = arith.constant 0 : i32
    return %arg0, %c0_i32, %c0_i32_0 : i32, i32, i32
  }
  func.func @transform_1(%arg0: i32) -> (i32, i32) {
    %c0_i32 = arith.constant 0 : i32
    %c0_i32_0 = arith.constant 0 : i32
    %c0_i32_1 = arith.constant 0 : i32
    return %c0_i32, %c0_i32_0 : i32, i32
  }
  func.func @transform_2(%arg0: i32) -> (i32, i32) {
    %c0_i32 = arith.constant 0 : i32
    %c0_i32_0 = arith.constant 0 : i32
    %c0_i32_1 = arith.constant 0 : i32
    return %c0_i32, %c0_i32_0 : i32, i32
  }
  func.func @transform_3(%arg0: i32) -> (i32, i32) {
    %c0_i32 = arith.constant 0 : i32
    %c0_i32_0 = arith.constant 0 : i32
    %c0_i32_1 = arith.constant 0 : i32
    return %c0_i32, %c0_i32_0 : i32, i32
  }
  func.func @transform_4(%arg0: i32) -> (i32, i32) {
    %c0_i32 = arith.constant 0 : i32
    %c0_i32_0 = arith.constant 0 : i32
    %c0_i32_1 = arith.constant 0 : i32
    return %c0_i32, %c0_i32_0 : i32, i32
  }
  func.func @transform_5(%arg0: i32) -> (i32, i32, i32) {
    %c0_i32 = arith.constant 0 : i32
    %c0_i32_0 = arith.constant 0 : i32
    %c0_i32_1 = arith.constant 0 : i32
    return %arg0, %c0_i32, %c0_i32_0 : i32, i32, i32
  }
}

module attributes {stable_mosaic.version = 11 : i64} {
  func.func @_encoder_kernel(%arg0: i32, %arg1: memref<1x17x32xf32, #tpu.memory_space<vmem>>, %arg2: memref<32x96xbf16, #tpu.memory_space<vmem>>, %arg3: memref<1x96xf32, #tpu.memory_space<vmem>>, %arg4: memref<4x8x32xbf16, #tpu.memory_space<vmem>>, %arg5: memref<1x32xf32, #tpu.memory_space<vmem>>, %arg6: memref<1x32xf32, #tpu.memory_space<vmem>>, %arg7: memref<1x32xf32, #tpu.memory_space<vmem>>, %arg8: memref<32x128xbf16, #tpu.memory_space<vmem>>, %arg9: memref<1x128xf32, #tpu.memory_space<vmem>>, %arg10: memref<128x32xbf16, #tpu.memory_space<vmem>>, %arg11: memref<1x32xf32, #tpu.memory_space<vmem>>, %arg12: memref<1x32xf32, #tpu.memory_space<vmem>>, %arg13: memref<1x32xf32, #tpu.memory_space<vmem>>, %arg14: memref<1x17x32xf32, #tpu.memory_space<vmem>>) attributes {dimension_semantics = [#tpu.dimension_semantics<parallel>], iteration_bounds = array<i64: 2>, scalar_prefetch = 0 : i64, scratch_operands = 0 : i64, tpu.core_type = #tpu.core_type<tc>, window_params = [{transform_indices = @transform_0, window_bounds = array<i64: 1, 17, 32>}, {pipeline_mode = #tpu.pipeline_mode<synchronous>, transform_indices = @transform_1, window_bounds = array<i64: 32, 96>}, {pipeline_mode = #tpu.pipeline_mode<synchronous>, transform_indices = @transform_2, window_bounds = array<i64: 1, 96>}, {pipeline_mode = #tpu.pipeline_mode<synchronous>, transform_indices = @transform_3, window_bounds = array<i64: 4, 8, 32>}, {pipeline_mode = #tpu.pipeline_mode<synchronous>, transform_indices = @transform_4, window_bounds = array<i64: 1, 32>}, {pipeline_mode = #tpu.pipeline_mode<synchronous>, transform_indices = @transform_5, window_bounds = array<i64: 1, 32>}, {pipeline_mode = #tpu.pipeline_mode<synchronous>, transform_indices = @transform_6, window_bounds = array<i64: 1, 32>}, {pipeline_mode = #tpu.pipeline_mode<synchronous>, transform_indices = @transform_7, window_bounds = array<i64: 32, 128>}, {pipeline_mode = #tpu.pipeline_mode<synchronous>, transform_indices = @transform_8, window_bounds = array<i64: 1, 128>}, {pipeline_mode = #tpu.pipeline_mode<synchronous>, transform_indices = @transform_9, window_bounds = array<i64: 128, 32>}, {pipeline_mode = #tpu.pipeline_mode<synchronous>, transform_indices = @transform_10, window_bounds = array<i64: 1, 32>}, {pipeline_mode = #tpu.pipeline_mode<synchronous>, transform_indices = @transform_11, window_bounds = array<i64: 1, 32>}, {pipeline_mode = #tpu.pipeline_mode<synchronous>, transform_indices = @transform_12, window_bounds = array<i64: 1, 32>}, {transform_indices = @transform_13, window_bounds = array<i64: 1, 17, 32>}]} {
    %c0 = arith.constant 0 : index
    %c0_0 = arith.constant 0 : index
    %c0_1 = arith.constant 0 : index
    %0 = vector.load %arg1[%c0, %c0_0, %c0_1] : memref<1x17x32xf32, #tpu.memory_space<vmem>>, vector<1x17x32xf32>
    %1 = vector.shape_cast %0 : vector<1x17x32xf32> to vector<17x32xf32>
    %2 = arith.truncf %1 : vector<17x32xf32> to vector<17x32xbf16>
    %c0_2 = arith.constant 0 : index
    %c0_3 = arith.constant 0 : index
    %3 = vector.load %arg2[%c0_2, %c0_3] : memref<32x96xbf16, #tpu.memory_space<vmem>>, vector<32x96xbf16>
    %cst = arith.constant dense<0.000000e+00> : vector<17x96xf32>
    %4 = tpu.matmul %2, %3, %cst {dimension_numbers = #tpu.dot_dimension_numbers<[1], [0], [0], [1], [0, 0, 1, 1], [], []>} : vector<17x32xbf16>, vector<32x96xbf16>, vector<17x96xf32> -> vector<17x96xf32>
    %c0_4 = arith.constant 0 : index
    %c0_5 = arith.constant 0 : index
    %5 = vector.load %arg3[%c0_4, %c0_5] : memref<1x96xf32, #tpu.memory_space<vmem>>, vector<1x96xf32>
    %6 = vector.broadcast %5 : vector<1x96xf32> to vector<17x96xf32>
    %7 = arith.addf %4, %6 : vector<17x96xf32>
    %8 = vector.extract_strided_slice %7 {offsets = [0, 0], sizes = [17, 32], strides = [1, 1]} : vector<17x96xf32> to vector<17x32xf32>
    %cst_6 = arith.constant 0.353553385 : f32
    %9 = vector.broadcast %cst_6 : f32 to vector<17x32xf32>
    %10 = arith.mulf %8, %9 : vector<17x32xf32>
    %11 = vector.extract_strided_slice %7 {offsets = [0, 32], sizes = [17, 32], strides = [1, 1]} : vector<17x96xf32> to vector<17x32xf32>
    %12 = vector.extract_strided_slice %7 {offsets = [0, 64], sizes = [17, 32], strides = [1, 1]} : vector<17x96xf32> to vector<17x32xf32>
    %13 = vector.extract_strided_slice %10 {offsets = [0, 0], sizes = [17, 8], strides = [1, 1]} : vector<17x32xf32> to vector<17x8xf32>
    %14 = vector.extract_strided_slice %10 {offsets = [0, 8], sizes = [17, 8], strides = [1, 1]} : vector<17x32xf32> to vector<17x8xf32>
    %15 = vector.extract_strided_slice %10 {offsets = [0, 16], sizes = [17, 8], strides = [1, 1]} : vector<17x32xf32> to vector<17x8xf32>
    %16 = vector.extract_strided_slice %10 {offsets = [0, 24], sizes = [17, 8], strides = [1, 1]} : vector<17x32xf32> to vector<17x8xf32>
    %17 = vector.shape_cast %13 : vector<17x8xf32> to vector<1x17x8xf32>
    %18 = vector.shape_cast %14 : vector<17x8xf32> to vector<1x17x8xf32>
    %19 = vector.shape_cast %15 : vector<17x8xf32> to vector<1x17x8xf32>
    %20 = vector.shape_cast %16 : vector<17x8xf32> to vector<1x17x8xf32>
    %21 = tpu.concatenate %17, %18, %19, %20 in 0 : vector<1x17x8xf32>, vector<1x17x8xf32>, vector<1x17x8xf32>, vector<1x17x8xf32> -> vector<4x17x8xf32>
    %22 = arith.truncf %21 : vector<4x17x8xf32> to vector<4x17x8xbf16>
    %23 = vector.extract_strided_slice %11 {offsets = [0, 0], sizes = [17, 8], strides = [1, 1]} : vector<17x32xf32> to vector<17x8xf32>
    %24 = vector.extract_strided_slice %11 {offsets = [0, 8], sizes = [17, 8], strides = [1, 1]} : vector<17x32xf32> to vector<17x8xf32>
    %25 = vector.extract_strided_slice %11 {offsets = [0, 16], sizes = [17, 8], strides = [1, 1]} : vector<17x32xf32> to vector<17x8xf32>
    %26 = vector.extract_strided_slice %11 {offsets = [0, 24], sizes = [17, 8], strides = [1, 1]} : vector<17x32xf32> to vector<17x8xf32>
    %27 = vector.shape_cast %23 : vector<17x8xf32> to vector<1x17x8xf32>
    %28 = vector.shape_cast %24 : vector<17x8xf32> to vector<1x17x8xf32>
    %29 = vector.shape_cast %25 : vector<17x8xf32> to vector<1x17x8xf32>
    %30 = vector.shape_cast %26 : vector<17x8xf32> to vector<1x17x8xf32>
    %31 = tpu.concatenate %27, %28, %29, %30 in 0 : vector<1x17x8xf32>, vector<1x17x8xf32>, vector<1x17x8xf32>, vector<1x17x8xf32> -> vector<4x17x8xf32>
    %32 = arith.truncf %31 : vector<4x17x8xf32> to vector<4x17x8xbf16>
    %33 = vector.extract_strided_slice %12 {offsets = [0, 0], sizes = [17, 8], strides = [1, 1]} : vector<17x32xf32> to vector<17x8xf32>
    %34 = vector.extract_strided_slice %12 {offsets = [0, 8], sizes = [17, 8], strides = [1, 1]} : vector<17x32xf32> to vector<17x8xf32>
    %35 = vector.extract_strided_slice %12 {offsets = [0, 16], sizes = [17, 8], strides = [1, 1]} : vector<17x32xf32> to vector<17x8xf32>
    %36 = vector.extract_strided_slice %12 {offsets = [0, 24], sizes = [17, 8], strides = [1, 1]} : vector<17x32xf32> to vector<17x8xf32>
    %37 = vector.shape_cast %33 : vector<17x8xf32> to vector<1x17x8xf32>
    %38 = vector.shape_cast %34 : vector<17x8xf32> to vector<1x17x8xf32>
    %39 = vector.shape_cast %35 : vector<17x8xf32> to vector<1x17x8xf32>
    %40 = vector.shape_cast %36 : vector<17x8xf32> to vector<1x17x8xf32>
    %41 = tpu.concatenate %37, %38, %39, %40 in 0 : vector<1x17x8xf32>, vector<1x17x8xf32>, vector<1x17x8xf32>, vector<1x17x8xf32> -> vector<4x17x8xf32>
    %42 = arith.truncf %41 : vector<4x17x8xf32> to vector<4x17x8xbf16>
    "tpu.trace_start"() <{level = 10 : i32, message = "hqd,hkd->hqk"}> : () -> ()
    %cst_7 = arith.constant dense<0.000000e+00> : vector<4x17x17xf32>
    %43 = tpu.matmul %22, %32, %cst_7 {dimension_numbers = #tpu.dot_dimension_numbers<[2], [2], [1], [1], [0, 0, 0, 1, 1, 1], [0], [0]>} : vector<4x17x8xbf16>, vector<4x17x8xbf16>, vector<4x17x17xf32> -> vector<4x17x17xf32>
    "tpu.trace_stop"() : () -> ()
    %cst_8 = arith.constant dense<0xFF800000> : vector<4x17xf32>
    %44 = vector.multi_reduction <maximumf>, %43, %cst_8 [2] : vector<4x17x17xf32> to vector<4x17xf32>
    %45 = vector.shape_cast %44 : vector<4x17xf32> to vector<4x17x1xf32>
    %46 = vector.broadcast %45 : vector<4x17x1xf32> to vector<4x17x17xf32>
    %47 = arith.subf %43, %46 : vector<4x17x17xf32>
    %48 = math.exp %47 : vector<4x17x17xf32>
    %cst_9 = arith.constant dense<0.000000e+00> : vector<4x17xf32>
    %49 = vector.multi_reduction <add>, %48, %cst_9 [2] : vector<4x17x17xf32> to vector<4x17xf32>
    %50 = vector.shape_cast %49 : vector<4x17xf32> to vector<4x17x1xf32>
    %51 = tpu.reciprocal %50 {approx = true} : vector<4x17x1xf32> -> vector<4x17x1xf32>
    %52 = vector.broadcast %51 : vector<4x17x1xf32> to vector<4x17x17xf32>
    %53 = arith.mulf %48, %52 : vector<4x17x17xf32>
    %54 = arith.truncf %53 : vector<4x17x17xf32> to vector<4x17x17xbf16>
    "tpu.trace_start"() <{level = 10 : i32, message = "hqk,hkd->hqd"}> : () -> ()
    %cst_10 = arith.constant dense<0.000000e+00> : vector<4x17x8xf32>
    %55 = tpu.matmul %54, %42, %cst_10 {dimension_numbers = #tpu.dot_dimension_numbers<[2], [1], [1], [2], [0, 0, 0, 1, 1, 2], [0], [0]>} : vector<4x17x17xbf16>, vector<4x17x8xbf16>, vector<4x17x8xf32> -> vector<4x17x8xf32>
    "tpu.trace_stop"() : () -> ()
    %56 = arith.truncf %55 : vector<4x17x8xf32> to vector<4x17x8xbf16>
    %c0_11 = arith.constant 0 : index
    %c0_12 = arith.constant 0 : index
    %c0_13 = arith.constant 0 : index
    %57 = vector.load %arg4[%c0_11, %c0_12, %c0_13] : memref<4x8x32xbf16, #tpu.memory_space<vmem>>, vector<4x8x32xbf16>
    "tpu.trace_start"() <{level = 10 : i32, message = "hqd,hde->hqe"}> : () -> ()
    %cst_14 = arith.constant dense<0.000000e+00> : vector<4x17x32xf32>
    %58 = tpu.matmul %56, %57, %cst_14 {dimension_numbers = #tpu.dot_dimension_numbers<[2], [1], [1], [2], [0, 0, 0, 1, 1, 2], [0], [0]>} : vector<4x17x8xbf16>, vector<4x8x32xbf16>, vector<4x17x32xf32> -> vector<4x17x32xf32>
    "tpu.trace_stop"() : () -> ()
    %cst_15 = arith.constant dense<0.000000e+00> : vector<17x32xf32>
    %59 = vector.multi_reduction <add>, %58, %cst_15 [0] : vector<4x17x32xf32> to vector<17x32xf32>
    %c0_16 = arith.constant 0 : index
    %c0_17 = arith.constant 0 : index
    %60 = vector.load %arg5[%c0_16, %c0_17] : memref<1x32xf32, #tpu.memory_space<vmem>>, vector<1x32xf32>
    %61 = vector.broadcast %60 : vector<1x32xf32> to vector<17x32xf32>
    %62 = arith.addf %59, %61 : vector<17x32xf32>
    %63 = arith.addf %1, %62 : vector<17x32xf32>
    %c0_18 = arith.constant 0 : index
    %c0_19 = arith.constant 0 : index
    %64 = vector.load %arg6[%c0_18, %c0_19] : memref<1x32xf32, #tpu.memory_space<vmem>>, vector<1x32xf32>
    %c0_20 = arith.constant 0 : index
    %c0_21 = arith.constant 0 : index
    %65 = vector.load %arg7[%c0_20, %c0_21] : memref<1x32xf32, #tpu.memory_space<vmem>>, vector<1x32xf32>
    %cst_22 = arith.constant dense<0.000000e+00> : vector<17xf32>
    %66 = vector.multi_reduction <add>, %63, %cst_22 [1] : vector<17x32xf32> to vector<17xf32>
    %67 = vector.shape_cast %66 : vector<17xf32> to vector<17x1xf32>
    %cst_23 = arith.constant 3.200000e+01 : f32
    %68 = vector.broadcast %cst_23 : f32 to vector<17x1xf32>
    %69 = arith.divf %67, %68 : vector<17x1xf32>
    %70 = vector.broadcast %69 : vector<17x1xf32> to vector<17x32xf32>
    %71 = arith.subf %63, %70 : vector<17x32xf32>
    %72 = arith.mulf %71, %71 : vector<17x32xf32>
    %cst_24 = arith.constant dense<0.000000e+00> : vector<17xf32>
    %73 = vector.multi_reduction <add>, %72, %cst_24 [1] : vector<17x32xf32> to vector<17xf32>
    %74 = vector.shape_cast %73 : vector<17xf32> to vector<17x1xf32>
    %cst_25 = arith.constant 3.200000e+01 : f32
    %75 = vector.broadcast %cst_25 : f32 to vector<17x1xf32>
    %76 = arith.divf %74, %75 : vector<17x1xf32>
    %77 = vector.broadcast %69 : vector<17x1xf32> to vector<17x32xf32>
    %78 = arith.subf %63, %77 : vector<17x32xf32>
    %cst_26 = arith.constant 9.99999974E-6 : f32
    %79 = vector.broadcast %cst_26 : f32 to vector<17x1xf32>
    %80 = arith.addf %76, %79 : vector<17x1xf32>
    %81 = math.rsqrt %80 : vector<17x1xf32>
    %82 = vector.broadcast %81 : vector<17x1xf32> to vector<17x32xf32>
    %83 = arith.mulf %78, %82 : vector<17x32xf32>
    %84 = vector.broadcast %64 : vector<1x32xf32> to vector<17x32xf32>
    %85 = arith.mulf %83, %84 : vector<17x32xf32>
    %86 = vector.broadcast %65 : vector<1x32xf32> to vector<17x32xf32>
    %87 = arith.addf %85, %86 : vector<17x32xf32>
    %88 = arith.truncf %87 : vector<17x32xf32> to vector<17x32xbf16>
    %c0_27 = arith.constant 0 : index
    %c0_28 = arith.constant 0 : index
    %89 = vector.load %arg8[%c0_27, %c0_28] : memref<32x128xbf16, #tpu.memory_space<vmem>>, vector<32x128xbf16>
    %cst_29 = arith.constant dense<0.000000e+00> : vector<17x128xf32>
    %90 = tpu.matmul %88, %89, %cst_29 {dimension_numbers = #tpu.dot_dimension_numbers<[1], [0], [0], [1], [0, 0, 1, 1], [], []>} : vector<17x32xbf16>, vector<32x128xbf16>, vector<17x128xf32> -> vector<17x128xf32>
    %c0_30 = arith.constant 0 : index
    %c0_31 = arith.constant 0 : index
    %91 = vector.load %arg9[%c0_30, %c0_31] : memref<1x128xf32, #tpu.memory_space<vmem>>, vector<1x128xf32>
    %92 = vector.broadcast %91 : vector<1x128xf32> to vector<17x128xf32>
    %93 = arith.addf %90, %92 : vector<17x128xf32>
    %cst_32 = arith.constant 5.000000e-01 : f32
    %94 = vector.broadcast %cst_32 : f32 to vector<17x128xf32>
    %95 = arith.mulf %94, %93 : vector<17x128xf32>
    %cst_33 = arith.constant 4.471500e-02 : f32
    %96 = vector.broadcast %cst_33 : f32 to vector<17x128xf32>
    %97 = arith.mulf %96, %93 : vector<17x128xf32>
    %98 = arith.mulf %97, %93 : vector<17x128xf32>
    %99 = arith.mulf %98, %93 : vector<17x128xf32>
    %100 = arith.addf %93, %99 : vector<17x128xf32>
    %cst_34 = arith.constant 0.797884583 : f32
    %101 = vector.broadcast %cst_34 : f32 to vector<17x128xf32>
    %102 = arith.mulf %101, %100 : vector<17x128xf32>
    %103 = math.tanh %102 : vector<17x128xf32>
    %cst_35 = arith.constant 1.000000e+00 : f32
    %104 = vector.broadcast %cst_35 : f32 to vector<17x128xf32>
    %105 = arith.addf %104, %103 : vector<17x128xf32>
    %106 = arith.mulf %95, %105 : vector<17x128xf32>
    %107 = arith.truncf %106 : vector<17x128xf32> to vector<17x128xbf16>
    %c0_36 = arith.constant 0 : index
    %c0_37 = arith.constant 0 : index
    %108 = vector.load %arg10[%c0_36, %c0_37] : memref<128x32xbf16, #tpu.memory_space<vmem>>, vector<128x32xbf16>
    %cst_38 = arith.constant dense<0.000000e+00> : vector<17x32xf32>
    %109 = tpu.matmul %107, %108, %cst_38 {dimension_numbers = #tpu.dot_dimension_numbers<[1], [0], [0], [1], [0, 0, 1, 1], [], []>} : vector<17x128xbf16>, vector<128x32xbf16>, vector<17x32xf32> -> vector<17x32xf32>
    %c0_39 = arith.constant 0 : index
    %c0_40 = arith.constant 0 : index
    %110 = vector.load %arg11[%c0_39, %c0_40] : memref<1x32xf32, #tpu.memory_space<vmem>>, vector<1x32xf32>
    %111 = vector.broadcast %110 : vector<1x32xf32> to vector<17x32xf32>
    %112 = arith.addf %109, %111 : vector<17x32xf32>
    %113 = arith.addf %87, %112 : vector<17x32xf32>
    %c0_41 = arith.constant 0 : index
    %c0_42 = arith.constant 0 : index
    %114 = vector.load %arg12[%c0_41, %c0_42] : memref<1x32xf32, #tpu.memory_space<vmem>>, vector<1x32xf32>
    %c0_43 = arith.constant 0 : index
    %c0_44 = arith.constant 0 : index
    %115 = vector.load %arg13[%c0_43, %c0_44] : memref<1x32xf32, #tpu.memory_space<vmem>>, vector<1x32xf32>
    %cst_45 = arith.constant dense<0.000000e+00> : vector<17xf32>
    %116 = vector.multi_reduction <add>, %113, %cst_45 [1] : vector<17x32xf32> to vector<17xf32>
    %117 = vector.shape_cast %116 : vector<17xf32> to vector<17x1xf32>
    %cst_46 = arith.constant 3.200000e+01 : f32
    %118 = vector.broadcast %cst_46 : f32 to vector<17x1xf32>
    %119 = arith.divf %117, %118 : vector<17x1xf32>
    %120 = vector.broadcast %119 : vector<17x1xf32> to vector<17x32xf32>
    %121 = arith.subf %113, %120 : vector<17x32xf32>
    %122 = arith.mulf %121, %121 : vector<17x32xf32>
    %cst_47 = arith.constant dense<0.000000e+00> : vector<17xf32>
    %123 = vector.multi_reduction <add>, %122, %cst_47 [1] : vector<17x32xf32> to vector<17xf32>
    %124 = vector.shape_cast %123 : vector<17xf32> to vector<17x1xf32>
    %cst_48 = arith.constant 3.200000e+01 : f32
    %125 = vector.broadcast %cst_48 : f32 to vector<17x1xf32>
    %126 = arith.divf %124, %125 : vector<17x1xf32>
    %127 = vector.broadcast %119 : vector<17x1xf32> to vector<17x32xf32>
    %128 = arith.subf %113, %127 : vector<17x32xf32>
    %cst_49 = arith.constant 9.99999974E-6 : f32
    %129 = vector.broadcast %cst_49 : f32 to vector<17x1xf32>
    %130 = arith.addf %126, %129 : vector<17x1xf32>
    %131 = math.rsqrt %130 : vector<17x1xf32>
    %132 = vector.broadcast %131 : vector<17x1xf32> to vector<17x32xf32>
    %133 = arith.mulf %128, %132 : vector<17x32xf32>
    %134 = vector.broadcast %114 : vector<1x32xf32> to vector<17x32xf32>
    %135 = arith.mulf %133, %134 : vector<17x32xf32>
    %136 = vector.broadcast %115 : vector<1x32xf32> to vector<17x32xf32>
    %137 = arith.addf %135, %136 : vector<17x32xf32>
    %c0_50 = arith.constant 0 : index
    %c0_51 = arith.constant 0 : index
    %c0_52 = arith.constant 0 : index
    %138 = vector.load %arg14[%c0_50, %c0_51, %c0_52] : memref<1x17x32xf32, #tpu.memory_space<vmem>>, vector<1x17x32xf32>
    %139 = vector.shape_cast %138 : vector<1x17x32xf32> to vector<17x32xf32>
    %140 = vector.shape_cast %137 : vector<17x32xf32> to vector<1x17x32xf32>
    tpu.vector_store %arg14[%c0_50, %c0_51, %c0_52], %140 {strides = array<i32>} : memref<1x17x32xf32, #tpu.memory_space<vmem>>, vector<1x17x32xf32>,
    return
  }
  func.func @transform_0(%arg0: i32) -> (i32, i32, i32) {
    %c0_i32 = arith.constant 0 : i32
    %c0_i32_0 = arith.constant 0 : i32
    %c0_i32_1 = arith.constant 0 : i32
    return %arg0, %c0_i32, %c0_i32_0 : i32, i32, i32
  }
  func.func @transform_1(%arg0: i32) -> (i32, i32) {
    %c0_i32 = arith.constant 0 : i32
    %c0_i32_0 = arith.constant 0 : i32
    %c0_i32_1 = arith.constant 0 : i32
    return %c0_i32, %c0_i32_0 : i32, i32
  }
  func.func @transform_2(%arg0: i32) -> (i32, i32) {
    %c0_i32 = arith.constant 0 : i32
    %c0_i32_0 = arith.constant 0 : i32
    %c0_i32_1 = arith.constant 0 : i32
    return %c0_i32, %c0_i32_0 : i32, i32
  }
  func.func @transform_3(%arg0: i32) -> (i32, i32, i32) {
    %c0_i32 = arith.constant 0 : i32
    %c0_i32_0 = arith.constant 0 : i32
    %c0_i32_1 = arith.constant 0 : i32
    %c0_i32_2 = arith.constant 0 : i32
    return %c0_i32, %c0_i32_0, %c0_i32_1 : i32, i32, i32
  }
  func.func @transform_4(%arg0: i32) -> (i32, i32) {
    %c0_i32 = arith.constant 0 : i32
    %c0_i32_0 = arith.constant 0 : i32
    %c0_i32_1 = arith.constant 0 : i32
    return %c0_i32, %c0_i32_0 : i32, i32
  }
  func.func @transform_5(%arg0: i32) -> (i32, i32) {
    %c0_i32 = arith.constant 0 : i32
    %c0_i32_0 = arith.constant 0 : i32
    %c0_i32_1 = arith.constant 0 : i32
    return %c0_i32, %c0_i32_0 : i32, i32
  }
  func.func @transform_6(%arg0: i32) -> (i32, i32) {
    %c0_i32 = arith.constant 0 : i32
    %c0_i32_0 = arith.constant 0 : i32
    %c0_i32_1 = arith.constant 0 : i32
    return %c0_i32, %c0_i32_0 : i32, i32
  }
  func.func @transform_7(%arg0: i32) -> (i32, i32) {
    %c0_i32 = arith.constant 0 : i32
    %c0_i32_0 = arith.constant 0 : i32
    %c0_i32_1 = arith.constant 0 : i32
    return %c0_i32, %c0_i32_0 : i32, i32
  }
  func.func @transform_8(%arg0: i32) -> (i32, i32) {
    %c0_i32 = arith.constant 0 : i32
    %c0_i32_0 = arith.constant 0 : i32
    %c0_i32_1 = arith.constant 0 : i32
    return %c0_i32, %c0_i32_0 : i32, i32
  }
  func.func @transform_9(%arg0: i32) -> (i32, i32) {
    %c0_i32 = arith.constant 0 : i32
    %c0_i32_0 = arith.constant 0 : i32
    %c0_i32_1 = arith.constant 0 : i32
    return %c0_i32, %c0_i32_0 : i32, i32
  }
  func.func @transform_10(%arg0: i32) -> (i32, i32) {
    %c0_i32 = arith.constant 0 : i32
    %c0_i32_0 = arith.constant 0 : i32
    %c0_i32_1 = arith.constant 0 : i32
    return %c0_i32, %c0_i32_0 : i32, i32
  }
  func.func @transform_11(%arg0: i32) -> (i32, i32) {
    %c0_i32 = arith.constant 0 : i32
    %c0_i32_0 = arith.constant 0 : i32
    %c0_i32_1 = arith.constant 0 : i32
    return %c0_i32, %c0_i32_0 : i32, i32
  }
  func.func @transform_12(%arg0: i32) -> (i32, i32) {
    %c0_i32 = arith.constant 0 : i32
    %c0_i32_0 = arith.constant 0 : i32
    %c0_i32_1 = arith.constant 0 : i32
    return %c0_i32, %c0_i32_0 : i32, i32
  }
  func.func @transform_13(%arg0: i32) -> (i32, i32, i32) {
    %c0_i32 = arith.constant 0 : i32
    %c0_i32_0 = arith.constant 0 : i32
    %c0_i32_1 = arith.constant 0 : i32
    return %arg0, %c0_i32, %c0_i32_0 : i32, i32, i32
  }
}

module attributes {stable_mosaic.version = 11 : i64} {
  func.func @_head_kernel(%arg0: memref<2x32xf32, #tpu.memory_space<vmem>>, %arg1: memref<1x32xf32, #tpu.memory_space<vmem>>, %arg2: memref<1x32xf32, #tpu.memory_space<vmem>>, %arg3: memref<32x10xbf16, #tpu.memory_space<vmem>>, %arg4: memref<1x10xf32, #tpu.memory_space<vmem>>, %arg5: memref<2x10xf32, #tpu.memory_space<vmem>>) attributes {dimension_semantics = [], scalar_prefetch = 0 : i64, scratch_operands = 0 : i64, tpu.core_type = #tpu.core_type<tc>} {
    %c0 = arith.constant 0 : index
    %c0_0 = arith.constant 0 : index
    %0 = vector.load %arg0[%c0, %c0_0] : memref<2x32xf32, #tpu.memory_space<vmem>>, vector<2x32xf32>
    %c0_1 = arith.constant 0 : index
    %c0_2 = arith.constant 0 : index
    %1 = vector.load %arg1[%c0_1, %c0_2] : memref<1x32xf32, #tpu.memory_space<vmem>>, vector<1x32xf32>
    %c0_3 = arith.constant 0 : index
    %c0_4 = arith.constant 0 : index
    %2 = vector.load %arg2[%c0_3, %c0_4] : memref<1x32xf32, #tpu.memory_space<vmem>>, vector<1x32xf32>
    %cst = arith.constant dense<0.000000e+00> : vector<2xf32>
    %3 = vector.multi_reduction <add>, %0, %cst [1] : vector<2x32xf32> to vector<2xf32>
    %4 = vector.shape_cast %3 : vector<2xf32> to vector<2x1xf32>
    %cst_5 = arith.constant 3.200000e+01 : f32
    %5 = vector.broadcast %cst_5 : f32 to vector<2x1xf32>
    %6 = arith.divf %4, %5 : vector<2x1xf32>
    %7 = vector.broadcast %6 : vector<2x1xf32> to vector<2x32xf32>
    %8 = arith.subf %0, %7 : vector<2x32xf32>
    %9 = arith.mulf %8, %8 : vector<2x32xf32>
    %cst_6 = arith.constant dense<0.000000e+00> : vector<2xf32>
    %10 = vector.multi_reduction <add>, %9, %cst_6 [1] : vector<2x32xf32> to vector<2xf32>
    %11 = vector.shape_cast %10 : vector<2xf32> to vector<2x1xf32>
    %cst_7 = arith.constant 3.200000e+01 : f32
    %12 = vector.broadcast %cst_7 : f32 to vector<2x1xf32>
    %13 = arith.divf %11, %12 : vector<2x1xf32>
    %14 = vector.broadcast %6 : vector<2x1xf32> to vector<2x32xf32>
    %15 = arith.subf %0, %14 : vector<2x32xf32>
    %cst_8 = arith.constant 9.99999974E-6 : f32
    %16 = vector.broadcast %cst_8 : f32 to vector<2x1xf32>
    %17 = arith.addf %13, %16 : vector<2x1xf32>
    %18 = math.rsqrt %17 : vector<2x1xf32>
    %19 = vector.broadcast %18 : vector<2x1xf32> to vector<2x32xf32>
    %20 = arith.mulf %15, %19 : vector<2x32xf32>
    %21 = vector.broadcast %1 : vector<1x32xf32> to vector<2x32xf32>
    %22 = arith.mulf %20, %21 : vector<2x32xf32>
    %23 = vector.broadcast %2 : vector<1x32xf32> to vector<2x32xf32>
    %24 = arith.addf %22, %23 : vector<2x32xf32>
    %25 = arith.truncf %24 : vector<2x32xf32> to vector<2x32xbf16>
    %c0_9 = arith.constant 0 : index
    %c0_10 = arith.constant 0 : index
    %26 = vector.load %arg3[%c0_9, %c0_10] : memref<32x10xbf16, #tpu.memory_space<vmem>>, vector<32x10xbf16>
    %cst_11 = arith.constant dense<0.000000e+00> : vector<2x10xf32>
    %27 = tpu.matmul %25, %26, %cst_11 {dimension_numbers = #tpu.dot_dimension_numbers<[1], [0], [0], [1], [0, 0, 1, 1], [], []>} : vector<2x32xbf16>, vector<32x10xbf16>, vector<2x10xf32> -> vector<2x10xf32>
    %c0_12 = arith.constant 0 : index
    %c0_13 = arith.constant 0 : index
    %28 = vector.load %arg4[%c0_12, %c0_13] : memref<1x10xf32, #tpu.memory_space<vmem>>, vector<1x10xf32>
    %29 = vector.broadcast %28 : vector<1x10xf32> to vector<2x10xf32>
    %30 = arith.addf %27, %29 : vector<2x10xf32>
    %c0_14 = arith.constant 0 : index
    %c0_15 = arith.constant 0 : index
    %31 = vector.load %arg5[%c0_14, %c0_15] : memref<2x10xf32, #tpu.memory_space<vmem>>, vector<2x10xf32>
    tpu.vector_store %arg5[%c0_14, %c0_15], %30 {strides = array<i32>} : memref<2x10xf32, #tpu.memory_space<vmem>>, vector<2x10xf32>,
    return
  }
}

</mosaic_0001>

<bundles_post_ra>
// kernel: vision_transformer_forward.4
= control target key start
LH: loop header
LB: loop body
LE: loop exit
PB: predicated region body
PF: predicated region fallthrough
CT: control target
= control target key end

     0   :  { %s449_s18 = smov 0   ;;  %s493_s0 = inlined_call_operand.vmem [shape: bf16[2,16,64], index: 0, kind: input, shape index: {}]   ;;  %s494_s1 = inlined_call_operand.vmem [shape: bf16[64,32], index: 1, kind: input, shape index: {}]   ;;  %s495_s2 = inlined_call_operand.vmem [shape: f32[1,32], index: 2, kind: input, shape index: {}]   ;;  %s496_s3 = inlined_call_operand.vmem [shape: f32[1,32], index: 3, kind: input, shape index: {}]   ;;  %s497_s4 = inlined_call_operand.vmem [shape: f32[17,32], index: 4, kind: input, shape index: {}]   ;;  %s498_s5 = inlined_call_operand.vmem [shape: f32[2,17,32], index: 5, kind: output, shape index: {}]  }
   0x1 LB: > { %s364_s19 = sadd.s32 4294967295, %s417_s18   ;;  %p368_p0 = scmp.ge.s32.totalorder %s417_s18, 1  ;;  %s417_s18 = sphi %s449_s18, %s15_s18  }
   0x2   : > { %p187_p1 = scmp.lt.s32.totalorder %s417_s18, 3 }
   0x4   : > { %p188_p2 = pnand %p368_p0, %p187_p1 }
   0x5   : > { %p215_p3 = scmp.lt.s32.totalorder (!%p188_p2), %s364_s19, 1 }
   0x6   : > { %191 = sbr.rel (%p188_p2) target bundleno = 169 (0xa9), region = 40 }
   0xb   : > { %v400_v0 = vld [vmem:[%s494_s1 + $0x18] sm:$0xff]  ;;  %v399_v1 = vld [vmem:[%s494_s1 + $0x10] sm:$0xff]  ;;  %s500_s19 = smov (!%p215_p3, %s364_s19), 1  ;;  %v398_v2 = vld [vmem:[%s494_s1 + $0x8] sm:$0xff]  ;;  %vm269_vm0 = vcmask 523264   ;;  %vm290_vm1 = vcmask 1040384  }
   0xc   : > { %277 = vmatpush.bf16.msra.mxu0 %v400_v0  ;;  %s395_s26 = sshll.u32 %s500_s19, 3  ;;  %v397_v3 = vld [vmem:[%s494_s1] sm:$0xff]  ;;  %s401_s9 = smul.u32 24, %s500_s19  ;;  %vm304_vm2 = vcmask 261120   ;;  %v300_v15 = vld [vmem:[%s497_s4 + $0x10] sm:$0x1] }
   0xd   : > { %s219_s6 = scalar_lea.vmem %s493_s0, %s395_s26  ;;  %v410_v5 = vld [vmem:[%s495_s2] ss:$0 sm:$0xff]  ;;  %v299_v17 = vld [vmem:[%s497_s4 + $0x8] sm:$0xff]  ;;  %vm307_vm3 = vcmask 253952  }
   0xe   : > { %v396_v4 = vld [vmem:[%s219_s6] sm:$0xff]  ;;  %s224_s16 = scalar_lea.vmem %s498_s5, %s401_s9 }
   0xf   : > { %v287_v8 = vld [vmem:[%s496_s3] sm:$0x1] }
  0x10   : > { %278 = vmatpush.bf16.msra.mxu0 %v399_v1  ;;  %v298_v10 = vld [vmem:[%s497_s4] sm:$0xff] }
  0x14   : > { %279 = vmatpush.bf16.msra.mxu0 %v398_v2 }
  0x18   : > { %280 = vmatpush.bf16.msra.mxu0 %v397_v3 }
  0x1b   : > { %392 = vmatmul.msk.bf16.vlgmr.msra.gmra.mxu0 %vm269_vm0, %v396_v4 }
  0x98   : > { %v282_v6 = vpop.f32.mrf.mxu0 }
  0x99   : > { %v283_v7 = vadd.f32 %v410_v5, %v282_v6 }
  0x9b   : > { %v291_v9 = vrot.slane %v283_v7, 7 }
  0x9d   : > { %v297_v11 = vsel %vm290_vm1, %v287_v8, %v291_v9 }
  0x9e   : > { %v301_v12 = vadd.f32 %v298_v10, %v297_v11 }
  0xa0   : > { %v284_v13 = vpop.f32.mrf.mxu0  ;;  %305 = vst.msk [vmem:[%s224_s16] sm:$0xff] %vm304_vm2, %v301_v12 }
  0xa1   : > { %v285_v14 = vadd.f32 %v410_v5, %v284_v13 }
  0xa3   : > { %v292_v16 = vrot.slane %v285_v14, 7 }
  0xa5   : > { %v293_v18 = vsel %vm290_vm1, %v291_v9, %v292_v16  ;;  %v303_v19 = vadd.f32 %v300_v15, %v292_v16 }
  0xa6   : > { %v302_v20 = vadd.f32 %v299_v17, %v293_v18 }
  0xa7   : > { %308 = vst.msk [vmem:[%s224_s16 + $0x10] sm:$0x1] %vm307_vm3, %v303_v19 }
  0xa8   : > { %306 = vst.msk [vmem:[%s224_s16 + $0x8] sm:$0xff] %vm304_vm2, %v302_v20 }
  0xa9 PF: > { %s15_s18 = sadd.s32 1, %s417_s18  }
  0xaa   : > { %p12_p4 = scmp.ge.s32.totalorder %s15_s18, 4  }
  0xac   :  { %14 = sbr.rel (!%p12_p4) target bundleno = 1 (0x1), region = 70 }

// kernel: vision_transformer_forward.7
= control target key start
LH: loop header
LB: loop body
LE: loop exit
PB: predicated region body
PF: predicated region fallthrough
CT: control target
= control target key end

     0   :  { %vm25_vm0 = vcmask 254976   ;;  %s220_s0 = inlined_call_operand.vmem [shape: f32[2,32], index: 0, kind: input, shape index: {}]   ;;  %s221_s1 = inlined_call_operand.vmem [shape: f32[1,32], index: 1, kind: input, shape index: {}]   ;;  %s222_s2 = inlined_call_operand.vmem [shape: f32[1,32], index: 2, kind: input, shape index: {}]   ;;  %s223_s3 = inlined_call_operand.vmem [shape: bf16[32,10], index: 3, kind: input, shape index: {}]   ;;  %s224_s4 = inlined_call_operand.vmem [shape: f32[1,10], index: 4, kind: input, shape index: {}]   ;;  %s225_s5 = inlined_call_operand.hbm [shape: f32[2,10], index: 5, kind: output, shape index: {}]  }
   0x1   :  { %v22_v0 = vld [vmem:[%s220_s0] sm:$0x3] }
   0x2   :  { %v26_v1 = vsel %vm25_vm0, %v22_v0, 0.0 }
   0x3   :  { %27 = vadd.xlane.f32.xlu0 %v26_v1 }
   0x4   :  { %10 = vsyncpa [#allocation3], 0  ;;  %v165_v2 = vmov 32.0   ;;  %v129_v14 = vld [vmem:[%s223_s3 + $0x8] sm:$0xff]  ;;  %v128_v15 = vld [vmem:[%s223_s3] sm:$0xff]  ;;  %vm84_vm5 = vcmask 261120  }
   0x5   :  { %135 = vrcp.f32 %v165_v2  ;;  %94 = vmatpush.bf16.msra.mxu0 %v129_v14  ;;  %v132_v25 = vld [vmem:[%s221_s1] ss:$0 sm:$0xff]  ;;  %s166_s28 = smov [#allocation2]   ;;  %s110_s1 = sshll.u32 %s225_s5, 4  ;;  %vm101_vm6 = vcmask 74752   ;;  %s111_s1 = int_to_ptr.hbm [resolvable:$true] %s110_s1 }
   0x6   :  { %v133_v28 = vld [vmem:[%s222_s2] ss:$0 sm:$0xff]  ;;  %s108_s29 = sshll.u32 %s166_s28, 4  ;;  %s109_s29 = int_to_ptr.vmem [resolvable:$true] %s108_s29 }
   0x7   :  { %v134_v32 = vld [vmem:[%s224_s4] ss:$0 sm:$0xff] }
   0x9   :  { %95 = vmatpush.bf16.msra.mxu0 %v128_v15 }
   0xb   :  { %v136_v3 = vpop.eup %135 }
   0xc   :  { %v30_v4 = vmul.f32 32.0, %v136_v3  ;;  %vm34_vm1 = vweird.f32 %v136_v3 }
   0xe   :  { %v31_v5 = vsub.f32 1.0, %v30_v4 }
  0x10   :  { %v32_v6 = vmul.f32 %v136_v3, %v31_v5 }
  0x12   :  { %v33_v7 = vadd.f32 %v136_v3, %v32_v6 }
  0x14   :  { %v35_v8 = vsel %vm34_vm1, %v136_v3, %v33_v7 }
  0x76   :  { %v28_v9 = vpop.xlane.xlu0 %27 }
  0x77   :  { %v36_v10 = vmul.f32 %v35_v8, %v28_v9 }
  0x79   :  { %v37_v11 = vsub.f32 %v22_v0, %v36_v10 }
  0x7b   :  { %v38_v12 = vmul.f32 %v37_v11, %v37_v11 }
  0x7d   :  { %v39_v13 = vsel %vm25_vm0, %v38_v12, 0.0 }
  0x7e   :  { %40 = vadd.xlane.f32.xlu0 %v39_v13 }
  0xf1   :  { %v41_v16 = vpop.xlane.xlu0 %40 }
  0xf2   :  { %v42_v17 = vmul.f32 %v41_v16, %v35_v8 }
  0xf4   :  { %v43_v18 = vadd.f32 1e-05, %v42_v17 }
  0xf6   :  { %137 = vrsqrt.f32 %v43_v18  ;;  %vm50_vm3 = vweird.f32 %v43_v18 }
  0xfc   :  { %v138_v19 = vpop.eup %137 }
  0xfd   :  { %v45_v20 = vmul.f32 %v138_v19, %v43_v18  ;;  %vm51_vm2 = vweird.f32 %v138_v19 }
  0xfe   :  { %vm52_vm4 = vmor %vm50_vm3, %vm51_vm2 }
  0xff   :  { %v46_v21 = vmul.f32 %v138_v19, %v45_v20 }
 0x101   :  { %v47_v22 = vmul.f32 0.5, %v46_v21 }
 0x103   :  { %v48_v23 = vsub.f32 1.5, %v47_v22 }
 0x105   :  { %v49_v24 = vmul.f32 %v138_v19, %v48_v23 }
 0x107   :  { %v53_v26 = vsel %vm52_vm4, %v138_v19, %v49_v24 }
 0x108   :  { %v54_v27 = vmul.f32 %v53_v26, %v37_v11 }
 0x10a   :  { %v58_v29 = vmul.f32 %v132_v25, %v54_v27 }
 0x10c   :  { %v62_v30 = vadd.f32 %v133_v28, %v58_v29 }
 0x10e   :  { %v63_v31 = vpack.c.bf16 %v62_v30, %v62_v30 }
 0x110   :  { %127 = vmatmul.msk.bf16.vlgmr.msra.gmra.mxu0 %vm84_vm5, %v63_v31 }
 0x18d   :  { %v97_v33 = vpop.f32.mrf.mxu0 }
 0x18e   :  { %v98_v34 = vadd.f32 %v134_v32, %v97_v33 }
 0x190   :  { %102 = vst.msk [vmem:[#allocation2] sm:$0x3] %vm101_vm6, %v98_v34 }
 0x191   :  { %113 = dma.vmem_to_hbm [thread:$0]  %s109_s29, 32, %s111_s1, [#allocation3]  }
 0x195   :  { %v99_v35 = vpop.f32.mrf.mxu0 }
 0x196   :  { %163 = dma.done.wait [#allocation3], 32  }
 0x197   :  { %164 = vsyncadd [#allocation3], 4294967264 }
 0x198   :  { %118 = vsyncpa [#allocation3], 1 }

// kernel: vision_transformer_forward.5
= control target key start
LH: loop header
LB: loop body
LE: loop exit
PB: predicated region body
PF: predicated region fallthrough
CT: control target
= control target key end

     0   :  { %s1975_s25 = smov 0   ;;  %s2363_s0 = inlined_call_operand.vmem [shape: f32[2,17,32], index: 0, kind: input, shape index: {}]   ;;  %s2364_s1 = inlined_call_operand.vmem [shape: bf16[32,96], index: 1, kind: input, shape index: {}]   ;;  %s2365_s2 = inlined_call_operand.vmem [shape: f32[1,96], index: 2, kind: input, shape index: {}]   ;;  %s2366_s3 = inlined_call_operand.vmem [shape: bf16[4,8,32], index: 3, kind: input, shape index: {}]   ;;  %s2367_s4 = inlined_call_operand.vmem [shape: f32[1,32], index: 4, kind: input, shape index: {}]   ;;  %s2368_s5 = inlined_call_operand.vmem [shape: f32[1,32], index: 5, kind: input, shape index: {}]   ;;  %s2369_s6 = inlined_call_operand.vmem [shape: f32[1,32], index: 6, kind: input, shape index: {}]   ;;  %s2370_s7 = inlined_call_operand.vmem [shape: bf16[32,128], index: 7, kind: input, shape index: {}]   ;;  %s2371_s8 = inlined_call_operand.vmem [shape: f32[1,128], index: 8, kind: input, shape index: {}]   ;;  %s2372_s9 = inlined_call_operand.vmem [shape: bf16[128,32], index: 9, kind: input, shape index: {}]   ;;  %s2373_s10 = inlined_call_operand.vmem [shape: f32[1,32], index: 10, kind: input, shape index: {}]   ;;  %s2374_s11 = inlined_call_operand.vmem [shape: f32[1,32], index: 11, kind: input, shape index: {}]   ;;  %s2375_s12 = inlined_call_operand.vmem [shape: f32[1,32], index: 12, kind: input, shape index: {}]   ;;  %s2376_s13 = inlined_call_operand.vmem [shape: f32[2,17,32], index: 13, kind: output, shape index: {}]  }
   0x1 LB: > { %s1667_s26 = sadd.s32 4294967295, %s1896_s25   ;;  %p1671_p0 = scmp.ge.s32.totalorder %s1896_s25, 1  ;;  %s1896_s25 = sphi %s1975_s25, %s23_s25  }
   0x2   : > { %p387_p1 = scmp.lt.s32.totalorder %s1896_s25, 3 }
   0x4   : > { %p388_p2 = pnand %p1671_p0, %p387_p1 }
   0x5   : > { %p431_p3 = scmp.lt.s32.totalorder (!%p388_p2), %s1667_s26, 1  ;;  %s1898_s20 = smov (!%p388_p2), 120  }
   0x6   : > { %391 = sbr.rel (%p388_p2) target bundleno = 2028 (0x7ec), region = 72  ;;  %s1899_s21 = smov (!%p388_p2), 112  }
   0x7   : > { %s1900_s22 = smov (!%p388_p2), 104   ;;  %s1901_s23 = smov (!%p388_p2), 96  }
   0x8   : > { %s1902_s24 = smov (!%p388_p2), 64  }
   0xb   : > { %v1753_v0 = vld [vmem:[%s2364_s1 + $0x8] sm:$0xff]  ;;  %v1752_v1 = vld [vmem:[%s2364_s1] sm:$0xff]  ;;  %s2378_s26 = smov (!%p431_p3, %s1667_s26), 1  ;;  %vm467_vm0 = vcmask 261120   ;;  %vm599_vm1 = vcmask 64512   ;;  %vm780_vm2 = vcmask 138240  }
   0xc   : > { %480 = vmatpush.bf16.msra.mxu0 %v1753_v0  ;;  %s1766_s14 = smul.u32 24, %s2378_s26  ;;  %v1812_v7 = vld [vmem:[%s2365_s2] ss:$0 sm:$0xff]  ;;  %vm787_vm3 = vcmask 131072   ;;  %vm945_vm4 = vcmask 1040384   ;;  %vm1119_vm5 = vcmask 1043456  }
   0xd   : > { %vm1260_vm6 = vcmask 253952  }
   0xe   : > { %s1997_s17 = scalar_lea.vmem %s2363_s0, %s1766_s14  ;;  %s440_s29 = scalar_lea.vmem %s2376_s13, %s1766_s14 }
   0xf   : > { %v2000_v2 = vld [vmem:[%s1997_s17] sm:$0xff]  ;;  %v443_v3 = vld [vmem:[%s1997_s17 + $0x8] sm:$0xff]  ;;  %v444_v5 = vld [vmem:[%s1997_s17 + $0x10] sm:$0x1] }
  0x10   : > { %481 = vmatpush.bf16.msra.mxu0 %v1752_v1  ;;  %v445_v4 = vpack.c.bf16 %v443_v3, %v2000_v2  ;;  %v446_v6 = vpack.c.bf16 %v444_v5, %v444_v5 }
  0x13   : > { %1682 = vmatmul.msk.bf16.vlgmr.msra.gmra.mxu0 %vm467_vm0, %v445_v4 }
  0x23   : > { %1683 = vmatmul.msk.bf16.gmra.mxu0 %vm467_vm0, %v446_v6 }
  0x90   : > { %v483_v8 = vpop.f32.mrf.mxu0 }
  0x91   : > { %v484_v9 = vadd.f32 %v1812_v7, %v483_v8 }
  0x93   : > { %v492_v11 = vmul.f32 0.35355338, %v484_v9  ;;  %v567_v25 = vpack.c.bf16 %v484_v9, %v484_v9 }
  0x95   : > { %v525_v14 = vpack.c.bf16 %v492_v11, %v492_v11  ;;  %v590_v27 = vunpack.c.l.b16 %v567_v25 }
  0x97   : > { %v2013_v18 = vunpack.c.l.b16 %v525_v14 }
  0x98   : > { %v485_v10 = vpop.f32.mrf.mxu0 }
  0x99   : > { %v486_v12 = vadd.f32 %v1812_v7, %v485_v10 }
  0x9b   : > { %542 = vrot.lane.b32.xlu1 %v486_v12, %s1898_s20  ;;  %v493_v13 = vmul.f32 0.35355338, %v486_v12  ;;  %v1787_v21 = vpack.i.bf16 %v486_v12, %v484_v9  ;;  %v568_v22 = vpack.c.bf16 %v486_v12, %v486_v12 }
  0x9d   : > { %v2011_v15 = vpack.i.bf16 %v493_v13, %v492_v11  ;;  %v526_v16 = vpack.c.bf16 %v493_v13, %v493_v13  ;;  %v591_v26 = vunpack.c.l.b16 %v568_v22 }
  0x9f   : > { %v2015_v19 = vunpack.c.l.b16 %v526_v16  ;;  %v2022_v29 = vpack.c.b16 %v591_v26, %v590_v27 }
  0xa0   : > { %v488_v17 = vpop.f32.mrf.mxu0 }
  0xa1   : > { %v489_v20 = vadd.f32 %v1812_v7, %v488_v17  ;;  %v585_v23 = vpack.c.b16 %v2015_v19, %v2013_v18 }
  0xa3   : > { %1788 = vrot.lane.b32.xlu1 %v1787_v21, %s1899_s21  ;;  %v1792_v24 = vpack.i.bf16 %v484_v9, %v489_v20  ;;  %v569_v30 = vpack.c.bf16 %v489_v20, %v489_v20  ;;  %v494_v0 = vmul.f32 0.35355338, %v489_v20 }
  0xa5   : > { %1793 = vrot.lane.b32.xlu2 %v1792_v24, %s1900_s22  ;;  %1783 = vrot.lane.b32.xlu0 %v1792_v24, %s1898_s20  ;;  %v592_v31 = vunpack.c.l.b16 %v569_v30  ;;  %v527_v7 = vpack.c.bf16 %v494_v0, %v494_v0 }
  0xa7   : > { %v2028_v32 = vpack.c.b16 %v592_v31, %v592_v31  ;;  %v584_v11 = vunpack.c.l.b16 %v527_v7 }
  0xa8   : > { %v490_v28 = vpop.f32.mrf.mxu0 }
  0xa9   : > { %v586_v13 = vpack.c.b16 %v584_v11, %v584_v11 }
  0xab   : > { %595 = vrot.lane.b32.xlu1 %v2022_v29, %s1901_s23 }
  0xad   : > { %560 = vrot.lane.b32.xlu2 %v486_v12, %s1900_s22  ;;  %553 = vrot.lane.b32.xlu0 %v489_v20, %s1899_s21 }
  0xb5   : > { %597 = vrot.lane.b32.xlu0 %v2028_v32, %s1901_s23 }
  0xff   : > { %v1794_v46 = vpop.permute.xlu2 %1793 }
 0x100   : > { %v1795_v51 = vunpack.i.l.bf16 %v1794_v46  ;;  %v1796_v62 = vunpack.i.h.bf16 %v1794_v46 }
 0x102   : > { %v578_v56 = vpack.c.bf16 %v1795_v51, %v1795_v51  ;;  %v576_v5 = vpack.c.bf16 %v1796_v62, %v1796_v62 }
 0x104   : > { %v743_v63 = vunpack.c.l.b16 %v578_v56  ;;  %v741_v10 = vunpack.c.l.b16 %v576_v5 }
 0x106   : > { %v2051_v6 = vpack.c.b16 %v743_v63, %v743_v63 }
 0x107   : > { %v561_v61 = vpop.permute.xlu2 %560 }
 0x108   : > { %v577_v1 = vpack.c.bf16 %v561_v61, %v561_v61 }
 0x10a   : > { %v742_v8 = vunpack.c.l.b16 %v577_v1 }
 0x10c   : > { %v2060_v12 = vpack.c.b16 %v742_v8, %v741_v10 }
 0x10d   : > { %v543_v33 = vpop.permute.xlu1 %542 }
 0x10e   : > { %v571_v35 = vpack.c.bf16 %v543_v33, %v543_v33 }
 0x110   : > { %v642_v40 = vunpack.c.l.b16 %v571_v35 }
 0x115   : > { %v1789_v43 = vpop.permute.xlu1 %1788 }
 0x116   : > { %v1791_v48 = vunpack.i.h.bf16 %v1789_v43  ;;  %v1790_v49 = vunpack.i.l.bf16 %v1789_v43 }
 0x117   : > { %v1784_v34 = vpop.permute.xlu0 %1783 }
 0x118   : > { %v1786_v36 = vunpack.i.h.bf16 %v1784_v34  ;;  %v1785_v37 = vunpack.i.l.bf16 %v1784_v34  ;;  %v574_v53 = vpack.c.bf16 %v1791_v48, %v1791_v48  ;;  %v573_v54 = vpack.c.bf16 %v1790_v49, %v1790_v49 }
 0x11a   : > { %v570_v38 = vpack.c.bf16 %v1786_v36, %v1786_v36  ;;  %v572_v39 = vpack.c.bf16 %v1785_v37, %v1785_v37  ;;  %v692_v58 = vunpack.c.l.b16 %v574_v53  ;;  %v691_v59 = vunpack.c.l.b16 %v573_v54 }
 0x11c   : > { %v641_v41 = vunpack.c.l.b16 %v570_v38  ;;  %v643_v42 = vunpack.c.l.b16 %v572_v39  ;;  %v2049_v3 = vpack.c.b16 %v692_v58, %v691_v59 }
 0x11d   : > { %v596_v4 = vpop.permute.xlu1 %595 }
 0x11e   : > { %v2032_v44 = vpack.c.b16 %v643_v42, %v643_v42  ;;  %v2034_v45 = vpack.c.b16 %v642_v40, %v641_v41  ;;  %v607_v9 = vsel %vm599_vm1, %v596_v4, 0 }
 0x11f   : > { %v554_v47 = vpop.permute.xlu0 %553 }
 0x120   : > { %v575_v50 = vpack.c.bf16 %v554_v47, %v554_v47  ;;  %648 = vrot.lane.b32.xlu2 %v2032_v44, %s1901_s23  ;;  %646 = vrot.lane.b32.xlu1 %v2034_v45, %s1901_s23 }
 0x122   : > { %v693_v52 = vunpack.c.l.b16 %v575_v50 }
 0x124   : > { %v2040_v55 = vpack.c.b16 %v693_v52, %v693_v52 }
 0x126   : > { %698 = vrot.lane.b32.xlu0 %v2040_v55, %s1901_s23 }
 0x127   : > { %v598_v57 = vpop.permute.xlu0 %597 }
 0x128   : > { %1803 = vrot.lane.b32.xlu1 %v2011_v15, %s1899_s21  ;;  %1798 = vrot.lane.b32.xlu2 %v2011_v15, %s1898_s20  ;;  %v610_v60 = vsel %vm599_vm1, %v598_v57, 0 }
 0x129   : > { %618 = vmatpush.bf16.xpose.msra.mxu1 %v610_v60  ;;  %1764 = vmatpush.bf16.xpose.msra.mxu3 %v610_v60 }
 0x12e   : > { %696 = vrot.lane.b32.xlu0 %v2049_v3, %s1901_s23 }
 0x130   : > { %1808 = vrot.lane.b32.xlu1 %v2011_v15, %s1900_s22  ;;  %748 = vrot.lane.b32.xlu2 %v2051_v6, %s1901_s23 }
 0x131   : > { %619 = vmatpush.bf16.xpose.msra.mxu1 %v607_v9  ;;  %1765 = vmatpush.bf16.xpose.msra.mxu3 %v607_v9 }
 0x136   : > { %746 = vrot.lane.b32.xlu0 %v2060_v12, %s1901_s23 }
 0x138   : > { %1685 = vmatmul.msk.bf16.vlgmr.msra.gmra.mxu3 %vm599_vm1, %v586_v13  ;;  %520 = vrot.lane.b32.xlu1 %v494_v0, %s1900_s22 }
 0x139   : > { %502 = vrot.lane.b32.xlu2 %v494_v0, %s1898_s20  ;;  %1684 = vmatmul.msk.bf16.vlgmr.msra.gmra.mxu1 %vm599_vm1, %v585_v23 }
 0x13e   : > { %511 = vrot.lane.b32.xlu0 %v494_v0, %s1899_s21 }
 0x17a   : > { %v649_v14 = vpop.permute.xlu2 %648 }
 0x17b   : > { %v660_v15 = vsel %vm599_vm1, %v649_v14, 0 }
 0x17c   : > { %668 = vmatpush.bf16.xpose.msra.mxu2 %v660_v15 }
 0x182   : > { %v1799_v16 = vpop.permute.xlu2 %1798 }
 0x183   : > { %v1801_v21 = vunpack.i.h.bf16 %v1799_v16  ;;  %v1800_v22 = vunpack.i.l.bf16 %v1799_v16 }
 0x185   : > { %v529_v24 = vpack.c.bf16 %v1801_v21, %v1801_v21  ;;  %v528_v25 = vpack.c.bf16 %v1800_v22, %v1800_v22 }
 0x187   : > { %v634_v19 = vunpack.c.l.b16 %v529_v24  ;;  %v633_v23 = vunpack.c.l.b16 %v528_v25 }
 0x189   : > { %v636_v30 = vpack.c.b16 %v634_v19, %v633_v23 }
 0x18a   : > { %v749_v17 = vpop.permute.xlu2 %748 }
 0x18b   : > { %v760_v20 = vsel %vm599_vm1, %v749_v17, 0 }
 0x18c   : > { %768 = vmatpush.bf16.xpose.msrb.mxu0 %v760_v20 }
 0x192   : > { %v647_v26 = vpop.permute.xlu1 %646 }
 0x193   : > { %v657_v18 = vsel %vm599_vm1, %v647_v26, 0  ;;  %v503_v35 = vpop.permute.xlu2 %502 }
 0x194   : > { %669 = vmatpush.bf16.xpose.msra.mxu2 %v657_v18  ;;  %v530_v39 = vpack.c.bf16 %v503_v35, %v503_v35 }
 0x196   : > { %v635_v48 = vunpack.c.l.b16 %v530_v39 }
 0x198   : > { %v699_v27 = vpop.permute.xlu0 %698  ;;  %v637_v53 = vpack.c.b16 %v635_v48, %v635_v48 }
 0x199   : > { %v710_v28 = vsel %vm599_vm1, %v699_v27, 0 }
 0x19a   : > { %718 = vmatpush.bf16.xpose.msrb.mxu3 %v710_v28  ;;  %v1804_v31 = vpop.permute.xlu1 %1803 }
 0x19b   : > { %v1806_v33 = vunpack.i.h.bf16 %v1804_v31  ;;  %v1805_v34 = vunpack.i.l.bf16 %v1804_v31  ;;  %1686 = vmatmul.msk.bf16.vlgmr.msra.gmra.mxu2 %vm599_vm1, %v636_v30 }
 0x19d   : > { %v532_v36 = vpack.c.bf16 %v1806_v33, %v1806_v33  ;;  %v531_v37 = vpack.c.bf16 %v1805_v34, %v1805_v34 }
 0x19f   : > { %v684_v42 = vunpack.c.l.b16 %v532_v36  ;;  %v683_v43 = vunpack.c.l.b16 %v531_v37 }
 0x1a0   : > { %v697_v38 = vpop.permute.xlu0 %696 }
 0x1a1   : > { %v707_v40 = vsel %vm599_vm1, %v697_v38, 0  ;;  %v686_v49 = vpack.c.b16 %v684_v42, %v683_v43 }
 0x1a2   : > { %719 = vmatpush.bf16.xpose.msrb.mxu3 %v707_v40  ;;  %v1809_v41 = vpop.permute.xlu1 %1808 }
 0x1a3   : > { %v1811_v46 = vunpack.i.h.bf16 %v1809_v41  ;;  %v1810_v47 = vunpack.i.l.bf16 %v1809_v41 }
 0x1a5   : > { %v535_v50 = vpack.c.bf16 %v1811_v46, %v1811_v46  ;;  %v534_v51 = vpack.c.bf16 %v1810_v47, %v1810_v47 }
 0x1a7   : > { %v734_v56 = vunpack.c.l.b16 %v535_v50  ;;  %v733_v57 = vunpack.c.l.b16 %v534_v51 }
 0x1a8   : > { %v747_v52 = vpop.permute.xlu0 %746 }
 0x1a9   : > { %1688 = vmatmul.msk.bf16.vlgmr.msrb.gmra.mxu3 %vm599_vm1, %v686_v49  ;;  %v757_v54 = vsel %vm599_vm1, %v747_v52, 0  ;;  %v736_v58 = vpack.c.b16 %v734_v56, %v733_v57 }
 0x1aa   : > { %769 = vmatpush.bf16.xpose.msrb.mxu0 %v757_v54  ;;  %v521_v62 = vpop.permute.xlu1 %520 }
 0x1ab   : > { %1687 = vmatmul.msk.bf16.gmra.mxu2 %vm599_vm1, %v637_v53  ;;  %v536_v0 = vpack.c.bf16 %v521_v62, %v521_v62  ;;  %v1903_v62 = vmov 0  }
 0x1ad   : > { %v735_v5 = vunpack.c.l.b16 %v536_v0 }
 0x1af   : > { %v737_v9 = vpack.c.b16 %v735_v5, %v735_v5 }
 0x1b0   : > { %v512_v59 = vpop.permute.xlu0 %511 }
 0x1b1   : > { %v533_v60 = vpack.c.bf16 %v512_v59, %v512_v59  ;;  %1690 = vmatmul.msk.bf16.vlgmr.msrb.gmra.mxu0 %vm599_vm1, %v736_v58 }
 0x1b3   : > { %v685_v61 = vunpack.c.l.b16 %v533_v60 }
 0x1b5   : > { %v687_v1 = vpack.c.b16 %v685_v61, %v685_v61 }
 0x1b6   : > { %v621_v63 = vpop.f32.mrf.mxu1 }
 0x1b7   : > { %v781_v4 = vsel %vm780_vm2, %v621_v63, -inf }
 0x1b8   : > { %782 = vmax.xlane.f32.xlu2 %v781_v4 }
 0x1b9   : > { %1689 = vmatmul.msk.bf16.gmra.mxu3 %vm599_vm1, %v687_v1 }
 0x1bb   : > { %v2084_v7 = vpop.f32.mrf.mxu3 }
 0x1bc   : > { %v788_v10 = vsel %vm787_vm3, %v2084_v7, -inf }
 0x1be   : > { %v623_v8 = vpop.f32.mrf.mxu1 }
 0x1bf   : > { %v784_v11 = vsel %vm780_vm2, %v623_v8, -inf }
 0x1c0   : > { %789 = vmax.xlane.f32.xlu2 %v788_v10  ;;  %785 = vmax.xlane.f32.xlu0 %v784_v11 }
 0x1c1   : > { %1691 = vmatmul.msk.bf16.gmra.mxu0 %vm599_vm1, %v737_v9 }
 0x1c3   : > { %v628_v13 = vpop.f32.mrf.mxu3 }
 0x21e   : > { %v671_v14 = vpop.f32.mrf.mxu2 }
 0x21f   : > { %v791_v15 = vsel %vm780_vm2, %v671_v14, -inf }
 0x220   : > { %792 = vmax.xlane.f32.xlu2 %v791_v15 }
 0x226   : > { %v673_v16 = vpop.f32.mrf.mxu2 }
 0x227   : > { %v794_v17 = vsel %vm780_vm2, %v673_v16, -inf }
 0x228   : > { %795 = vmax.xlane.f32.xlu0 %v794_v17 }
 0x22b   : > { %v783_v20 = vpop.xlane.xlu2 %782 }
 0x22c   : > { %v2092_v21 = vpop.f32.mrf.mxu3  ;;  %v818_v22 = vsub.f32 %v621_v63, %v783_v20  ;;  %v2145_v63 = vsel %vm945_vm4, 65535, %v1903_v62 }
 0x22d   : > { %v800_v28 = vsel %vm780_vm2, %v2092_v21, -inf }
 0x22e   : > { %v2094_v24 = vpop.f32.mrf.mxu2  ;;  %v2096_v25 = vpop.f32.mrf.mxu0  ;;  %v830_v18 = vmul.f32 1.442695, %v818_v22 }
 0x22f   : > { %v809_v26 = vsel %vm780_vm2, %v2096_v25, -inf }
 0x230   : > { %810 = vmax.xlane.f32.xlu1 %v809_v26  ;;  %1820 = vpow2.f32 %v830_v18 }
 0x233   : > { %v786_v39 = vpop.xlane.xlu0 %785  ;;  %v2132_v46 = vpop.xlane.xlu2 %789 }
 0x234   : > { %v2100_v19 = vpop.f32.mrf.mxu3  ;;  %v819_v40 = vsub.f32 %v623_v8, %v786_v39 }
 0x235   : > { %v803_v35 = vsel %vm780_vm2, %v2100_v19, -inf }
 0x236   : > { %v678_v23 = vpop.f32.mrf.mxu2  ;;  %v2102_v27 = vpop.f32.mrf.mxu0  ;;  %v832_v41 = vmul.f32 1.442695, %v819_v40 }
 0x237   : > { %v812_v30 = vsel %vm780_vm2, %v2102_v27, -inf  ;;  %v2108_v31 = vpop.eup %1820 }
 0x238   : > { %801 = vmax.xlane.f32.xlu1 %v800_v28  ;;  %813 = vmax.xlane.f32.xlu2 %v812_v30  ;;  %v854_v36 = vsel %vm780_vm2, %v2108_v31, 0.0  ;;  %1822 = vpow2.f32 %v832_v41 }
 0x23c   : > { %v2110_v33 = vpop.f32.mrf.mxu3  ;;  %1019 = vrot.lane.b32.xlu0 %v2040_v55, %s1902_s24  ;;  %v797_v55 = vsel %vm787_vm3, %v2094_v24, -inf }
 0x23e   : > { %v2114_v34 = vpop.f32.mrf.mxu0  ;;  %v2128_v43 = vpop.eup %1822 }
 0x23f   : > { %v815_v42 = vsel %vm787_vm3, %v2114_v34, -inf }
 0x240   : > { %804 = vmax.xlane.f32.xlu2 %v803_v35  ;;  %855 = vadd.xlane.f32.xlu1 %v854_v36  ;;  %v820_v36 = vsub.f32 %v2084_v7, %v2132_v46 }
 0x244   : > { %v728_v37 = vpop.f32.mrf.mxu3 }
 0x246   : > { %v778_v38 = vpop.f32.mrf.mxu0 }
 0x247   : > { %v834_v38 = vmul.f32 1.442695, %v820_v36 }
 0x258   : > { %979 = vrot.lane.b32.xlu2 %v2032_v44, %s1902_s24  ;;  %v857_v44 = vsel %vm780_vm2, %v2128_v43, 0.0 }
 0x259   : > { %977 = vrot.lane.b32.xlu1 %v2034_v45, %s1902_s24  ;;  %v806_v45 = vsel %vm787_vm3, %v2110_v33, -inf }
 0x266   : > { %798 = vmax.xlane.f32.xlu0 %v797_v55 }
 0x283   : > { %816 = vmax.xlane.f32.xlu1 %v815_v42 }
 0x28b   : > { %858 = vadd.xlane.f32.xlu1 %v857_v44 }
 0x293   : > { %v793_v47 = vpop.xlane.xlu2 %792  ;;  %807 = vmax.xlane.f32.xlu1 %v806_v45 }
 0x294   : > { %v821_v48 = vsub.f32 %v671_v14, %v793_v47 }
 0x296   : > { %v836_v49 = vmul.f32 1.442695, %v821_v48 }
 0x298   : > { %1824 = vpow2.f32 %v836_v49 }
 0x29b   : > { %v796_v50 = vpop.xlane.xlu0 %795 }
 0x29c   : > { %v822_v51 = vsub.f32 %v673_v16, %v796_v50 }
 0x29e   : > { %v2136_v52 = vpop.eup %1824  ;;  %v838_v53 = vmul.f32 1.442695, %v822_v51 }
 0x29f   : > { %v863_v54 = vsel %vm780_vm2, %v2136_v52, 0.0 }
 0x2a0   : > { %1826 = vpow2.f32 %v838_v53  ;;  %864 = vadd.xlane.f32.xlu0 %v863_v54 }
 0x2a3   : > { %v811_v56 = vpop.xlane.xlu1 %810 }
 0x2a4   : > { %v827_v0 = vsub.f32 %v2096_v25, %v811_v56 }
 0x2a6   : > { %v2140_v57 = vpop.eup %1826  ;;  %v848_v8 = vmul.f32 1.442695, %v827_v0 }
 0x2a7   : > { %v866_v58 = vsel %vm780_vm2, %v2140_v57, 0.0 }
 0x2a8   : > { %867 = vadd.xlane.f32.xlu1 %v866_v58 }
 0x2ab   : > { %v802_v59 = vpop.xlane.xlu1 %801  ;;  %v814_v60 = vpop.xlane.xlu2 %813 }
 0x2ac   : > { %v824_v61 = vsub.f32 %v2092_v21, %v802_v59 }
 0x2ae   : > { %v842_v1 = vmul.f32 1.442695, %v824_v61  ;;  %v1020_v4 = vpop.permute.xlu0 %1019 }
 0x2af   : > { %v1029_v5 = vand.u32 %v1020_v4, %v2145_v63 }
 0x2b0   : > { %1828 = vpow2.f32 %v842_v1 }
 0x2b1   : > { %1037 = vmatpush.bf16.msra.mxu3 %v1029_v5  ;;  %1830 = vpow2.f32 %v848_v8 }
 0x2b3   : > { %v805_v9 = vpop.xlane.xlu2 %804  ;;  %v856_v25 = vpop.xlane.xlu1 %855 }
 0x2b4   : > { %v825_v10 = vsub.f32 %v2100_v19, %v805_v9 }
 0x2b6   : > { %v2150_v11 = vpop.eup %1828  ;;  %v844_v13 = vmul.f32 1.442695, %v825_v10 }
 0x2b7   : > { %v872_v14 = vsel %vm780_vm2, %v2150_v11, 0.0  ;;  %v2154_v16 = vpop.eup %1830 }
 0x2b8   : > { %1832 = vpow2.f32 %v844_v13  ;;  %873 = vadd.xlane.f32.xlu2 %v872_v14  ;;  %v881_v21 = vsel %vm780_vm2, %v2154_v16, 0.0 }
 0x2bb   : > { %v980_v15 = vpop.permute.xlu2 %979 }
 0x2bc   : > { %v989_v17 = vand.u32 %v980_v15, %v2145_v63 }
 0x2be   : > { %v2157_v20 = vpop.eup %1832  ;;  %997 = vmatpush.bf16.msrb.mxu2 %v989_v17 }
 0x2bf   : > { %v875_v22 = vsel %vm780_vm2, %v2157_v20, 0.0 }
 0x2c0   : > { %882 = vadd.xlane.f32.xlu2 %v881_v21  ;;  %876 = vadd.xlane.f32.xlu0 %v875_v22 }
 0x2c1   : > { %936 = vrot.lane.b32.xlu1 %v2028_v32, %s1902_s24  ;;  %v828_v32 = vsub.f32 %v2102_v27, %v814_v60 }
 0x2c3   : > { %v850_v28 = vmul.f32 1.442695, %v828_v32 }
 0x2c9   : > { %1059 = vrot.lane.b32.xlu1 %v2051_v6, %s1902_s24 }
 0x2cb   : > { %v978_v26 = vpop.permute.xlu1 %977 }
 0x2cc   : > { %998 = vmatpush.bf16.msrb.mxu2 %v978_v26 }
 0x2d1   : > { %934 = vrot.lane.b32.xlu1 %v2022_v29, %s1902_s24 }
 0x2d4   : > { %1017 = vrot.lane.b32.xlu0 %v2049_v3, %s1902_s24 }
 0x2d8   : > { %1057 = vrot.lane.b32.xlu2 %v2060_v12, %s1902_s24 }
 0x2d9   : > { %v799_v18 = vpop.xlane.xlu0 %798 }
 0x2da   : > { %v823_v19 = vsub.f32 %v2094_v24, %v799_v18 }
 0x2dc   : > { %v840_v23 = vmul.f32 1.442695, %v823_v19 }
 0x2de   : > { %1834 = vpow2.f32 %v840_v23 }
 0x2df   : > { %1836 = vpow2.f32 %v850_v28 }
 0x2e4   : > { %v2175_v30 = vpop.eup %1834 }
 0x2e5   : > { %v2177_v35 = vpop.eup %1836  ;;  %v869_v29 = vsel %vm787_vm3, %v2175_v30, 0.0 }
 0x2e6   : > { %v884_v3 = vsel %vm780_vm2, %v2177_v35, 0.0 }
 0x2f6   : > { %v817_v6 = vpop.xlane.xlu1 %816 }
 0x2f7   : > { %v829_v39 = vsub.f32 %v2114_v34, %v817_v6 }
 0x2f9   : > { %v852_v42 = vmul.f32 1.442695, %v829_v39 }
 0x2fb   : > { %870 = vadd.xlane.f32.xlu1 %v869_v29 }
 0x2fe   : > { %885 = vadd.xlane.f32.xlu0 %v884_v3  ;;  %v859_v12 = vpop.xlane.xlu1 %858 }
 0x306   : > { %v808_v24 = vpop.xlane.xlu1 %807 }
 0x307   : > { %v826_v27 = vsub.f32 %v2110_v33, %v808_v24 }
 0x309   : > { %v846_v37 = vmul.f32 1.442695, %v826_v27 }
 0x30b   : > { %1838 = vpow2.f32 %v846_v37 }
 0x30c   : > { %1840 = vpow2.f32 %v834_v38 }
 0x311   : > { %v2186_v55 = vpop.eup %1838 }
 0x312   : > { %v878_v40 = vsel %vm787_vm3, %v2186_v55, 0.0  ;;  %v2191_v44 = vpop.eup %1840 }
 0x313   : > { %879 = vadd.xlane.f32.xlu0 %v878_v40  ;;  %v865_v41 = vpop.xlane.xlu0 %864  ;;  %v860_v7 = vsel %vm787_vm3, %v2191_v44, 0.0 }
 0x314   : > { %1842 = vrcp.f32 %v865_v41 }
 0x315   : > { %1844 = vpow2.f32 %v852_v42 }
 0x31a   : > { %v1843_v46 = vpop.eup %1842 }
 0x31b   : > { %861 = vadd.xlane.f32.xlu0 %v860_v7  ;;  %v868_v33 = vpop.xlane.xlu1 %867  ;;  %v2195_v45 = vpop.eup %1844  ;;  %v905_v34 = vmul.f32 %v1843_v46, %v2136_v52 }
 0x31c   : > { %1846 = vrcp.f32 %v868_v33  ;;  %v887_v48 = vsel %vm787_vm3, %v2195_v45, 0.0 }
 0x31d   : > { %v917_v49 = vpack.c.bf16 %v905_v34, %v905_v34  ;;  %1848 = vrcp.f32 %v859_v12 }
 0x31e   : > { %1850 = vrcp.f32 %v856_v25 }
 0x31f   : > { %v972_v53 = vunpack.c.l.b16 %v917_v49 }
 0x322   : > { %v1847_v47 = vpop.eup %1846 }
 0x323   : > { %v906_v50 = vmul.f32 %v1847_v47, %v2140_v57  ;;  %888 = vadd.xlane.f32.xlu0 %v887_v48  ;;  %v1849_v61 = vpop.eup %1848 }
 0x324   : > { %v1851_v57 = vpop.eup %1850  ;;  %v903_v0 = vmul.f32 %v1849_v61, %v2128_v43 }
 0x325   : > { %v918_v51 = vpack.c.bf16 %v906_v50, %v906_v50  ;;  %v902_v5 = vmul.f32 %v1851_v57, %v2108_v31 }
 0x326   : > { %v915_v13 = vpack.c.bf16 %v903_v0, %v903_v0 }
 0x327   : > { %v973_v54 = vunpack.c.l.b16 %v918_v51  ;;  %v914_v15 = vpack.c.bf16 %v902_v5, %v902_v5  ;;  %v1102_v51 = vld [vmem:[%s2366_s3 + $0x4] sm:$0xf] }
 0x328   : > { %v930_v21 = vunpack.c.l.b16 %v915_v13 }
 0x329   : > { %v975_v56 = vpack.c.b16 %v973_v54, %v972_v53  ;;  %v929_v43 = vunpack.c.l.b16 %v914_v15 }
 0x32b   : > { %1694 = vmatmul.msk.bf16.vlgmr.msrb.gmra.mxu2 %vm780_vm2, %v975_v56  ;;  %v874_v58 = vpop.xlane.xlu2 %873  ;;  %v932_v31 = vpack.c.b16 %v930_v21, %v929_v43 }
 0x32c   : > { %1852 = vrcp.f32 %v874_v58 }
 0x332   : > { %v1853_v1 = vpop.eup %1852 }
 0x333   : > { %v937_v59 = vpop.permute.xlu1 %936  ;;  %v877_v60 = vpop.xlane.xlu0 %876  ;;  %v908_v14 = vmul.f32 %v1853_v1, %v2150_v11 }
 0x334   : > { %v949_v52 = vand.u32 %v2145_v63, %v937_v59  ;;  %1854 = vrcp.f32 %v877_v60  ;;  %v883_v62 = vpop.xlane.xlu2 %882  ;;  %v1101_v60 = vld [vmem:[%s2366_s3] sm:$0xf] }
 0x335   : > { %v920_v25 = vpack.c.bf16 %v908_v14, %v908_v14  ;;  %1856 = vrcp.f32 %v883_v62  ;;  %v1121_v61 = vsel %vm1119_vm5, %v1101_v60, 0 }
 0x336   : > { %957 = vmatpush.bf16.msrb.mxu1 %v949_v52 }
 0x337   : > { %v1012_v19 = vunpack.c.l.b16 %v920_v25 }
 0x33a   : > { %v1855_v4 = vpop.eup %1854 }
 0x33b   : > { %v1060_v8 = vpop.permute.xlu1 %1059  ;;  %v909_v9 = vmul.f32 %v1855_v4, %v2157_v20  ;;  %v1857_v23 = vpop.eup %1856 }
 0x33c   : > { %v1069_v10 = vand.u32 %v1060_v8, %v2145_v63  ;;  %v1058_v22 = vpop.permute.xlu2 %1057  ;;  %v911_v6 = vmul.f32 %v1857_v23, %v2154_v16 }
 0x33d   : > { %v921_v17 = vpack.c.bf16 %v909_v9, %v909_v9  ;;  %v1104_v9 = vld [vmem:[%s2366_s3 + $0xc] sm:$0xf] }
 0x33e   : > { %1077 = vmatpush.bf16.msra.mxu0 %v1069_v10  ;;  %v923_v24 = vpack.c.bf16 %v911_v6, %v911_v6  ;;  %v1226_v10 = vsel %vm1119_vm5, %v1104_v9, 0 }
 0x33f   : > { %v1013_v18 = vunpack.c.l.b16 %v921_v17 }
 0x340   : > { %v1052_v39 = vunpack.c.l.b16 %v923_v24 }
 0x341   : > { %v1015_v63 = vpack.c.b16 %v1013_v18, %v1012_v19 }
 0x342   : > { %1078 = vmatpush.bf16.msra.mxu0 %v1058_v22 }
 0x343   : > { %v935_v26 = vpop.permute.xlu1 %934 }
 0x344   : > { %958 = vmatpush.bf16.msrb.mxu1 %v935_v26 }
 0x346   : > { %v1018_v32 = vpop.permute.xlu0 %1017  ;;  %1235 = vmatpush.bf16.msrb.mxu0 %v1226_v10 }
 0x347   : > { %1692 = vmatmul.msk.bf16.vlgmr.msrb.gmra.mxu1 %vm780_vm2, %v932_v31  ;;  %1038 = vmatpush.bf16.msra.mxu3 %v1018_v32 }
 0x348   : > { %1130 = vmatpush.bf16.msra.mxu1 %v1121_v61  ;;  %v1813_v61 = vld [vmem:[%s2367_s4] ss:$0 sm:$0xff] }
 0x34a   : > { %1696 = vmatmul.msk.bf16.vlgmr.msra.gmra.mxu3 %vm780_vm2, %v1015_v63 }
 0x36e   : > { %v871_v11 = vpop.xlane.xlu1 %870 }
 0x36f   : > { %1858 = vrcp.f32 %v871_v11 }
 0x371   : > { %v886_v20 = vpop.xlane.xlu0 %885 }
 0x372   : > { %1860 = vrcp.f32 %v886_v20 }
 0x375   : > { %v1859_v28 = vpop.eup %1858 }
 0x376   : > { %v907_v29 = vmul.f32 %v1859_v28, %v2175_v30 }
 0x378   : > { %v1861_v3 = vpop.eup %1860  ;;  %v919_v12 = vpack.c.bf16 %v907_v29, %v907_v29 }
 0x379   : > { %v912_v27 = vmul.f32 %v1861_v3, %v2177_v35 }
 0x37a   : > { %v974_v36 = vunpack.c.l.b16 %v919_v12 }
 0x37b   : > { %v924_v37 = vpack.c.bf16 %v912_v27, %v912_v27 }
 0x37c   : > { %v976_v38 = vpack.c.b16 %v974_v36, %v974_v36 }
 0x37d   : > { %v1053_v40 = vunpack.c.l.b16 %v924_v37 }
 0x37e   : > { %1695 = vmatmul.msk.bf16.gmra.mxu2 %vm780_vm2, %v976_v38 }
 0x37f   : > { %v1055_v41 = vpack.c.b16 %v1053_v40, %v1052_v39 }
 0x381   : > { %1698 = vmatmul.msk.bf16.vlgmr.msra.gmra.mxu0 %vm780_vm2, %v1055_v41 }
 0x386   : > { %v880_v42 = vpop.xlane.xlu0 %879 }
 0x387   : > { %1862 = vrcp.f32 %v880_v42 }
 0x38d   : > { %v1863_v16 = vpop.eup %1862 }
 0x38e   : > { %v862_v7 = vpop.xlane.xlu0 %861  ;;  %v910_v30 = vmul.f32 %v1863_v16, %v2186_v55  ;;  %v1156_v55 = vsel %vm1119_vm5, %v1102_v51, 0 }
 0x38f   : > { %1864 = vrcp.f32 %v862_v7  ;;  %1165 = vmatpush.bf16.msra.mxu2 %v1156_v55 }
 0x390   : > { %v922_v33 = vpack.c.bf16 %v910_v30, %v910_v30 }
 0x392   : > { %v1014_v46 = vunpack.c.l.b16 %v922_v33 }
 0x394   : > { %v1016_v35 = vpack.c.b16 %v1014_v46, %v1014_v46 }
 0x395   : > { %v1865_v34 = vpop.eup %1864 }
 0x396   : > { %1697 = vmatmul.msk.bf16.gmra.mxu3 %vm780_vm2, %v1016_v35  ;;  %v889_v47 = vpop.xlane.xlu0 %888  ;;  %v904_v48 = vmul.f32 %v1865_v34, %v2191_v44 }
 0x397   : > { %1866 = vrcp.f32 %v889_v47 }
 0x398   : > { %v916_v49 = vpack.c.bf16 %v904_v48, %v904_v48 }
 0x39a   : > { %v931_v50 = vunpack.c.l.b16 %v916_v49 }
 0x39c   : > { %v933_v53 = vpack.c.b16 %v931_v50, %v931_v50 }
 0x39d   : > { %v1867_v54 = vpop.eup %1866 }
 0x39e   : > { %1693 = vmatmul.msk.bf16.gmra.mxu1 %vm780_vm2, %v933_v53  ;;  %v913_v56 = vmul.f32 %v1867_v54, %v2195_v45  ;;  %v1103_v45 = vld [vmem:[%s2366_s3 + $0x8] sm:$0xf] }
 0x39f   : > { %v1191_v5 = vsel %vm1119_vm5, %v1103_v45, 0 }
 0x3a0   : > { %v925_v58 = vpack.c.bf16 %v913_v56, %v913_v56  ;;  %1200 = vmatpush.bf16.msrb.mxu3 %v1191_v5 }
 0x3a2   : > { %v1054_v59 = vunpack.c.l.b16 %v925_v58 }
 0x3a4   : > { %v1056_v44 = vpack.c.b16 %v1054_v59, %v1054_v59 }
 0x3a6   : > { %1699 = vmatmul.msk.bf16.gmra.mxu0 %vm780_vm2, %v1056_v44 }
 0x3ae   : > { %v1000_v52 = vpop.f32.mrf.mxu2 }
 0x3af   : > { %v1092_v62 = vpack.c.bf16 %v1000_v52, %v1000_v52 }
 0x3b1   : > { %v1144_v1 = vunpack.c.l.b16 %v1092_v62 }
 0x3b6   : > { %v1002_v57 = vpop.f32.mrf.mxu2 }
 0x3b7   : > { %v1093_v0 = vpack.c.bf16 %v1002_v57, %v1002_v57 }
 0x3b9   : > { %v1145_v4 = vunpack.c.l.b16 %v1093_v0 }
 0x3bb   : > { %v1147_v8 = vpack.c.b16 %v1145_v4, %v1144_v1 }
 0x3bd   : > { %1702 = vmatmul.msk.bf16.vlgmr.msra.gmra.mxu2 %vm599_vm1, %v1147_v8 }
 0x3c4   : > { %v960_v13 = vpop.f32.mrf.mxu1 }
 0x3c5   : > { %v1089_v14 = vpack.c.bf16 %v960_v13, %v960_v13 }
 0x3c7   : > { %v1108_v22 = vunpack.c.l.b16 %v1089_v14 }
 0x3cc   : > { %v962_v15 = vpop.f32.mrf.mxu1 }
 0x3cd   : > { %v1090_v17 = vpack.c.bf16 %v962_v15, %v962_v15  ;;  %v1040_v21 = vpop.f32.mrf.mxu3 }
 0x3ce   : > { %v1095_v26 = vpack.c.bf16 %v1040_v21, %v1040_v21 }
 0x3cf   : > { %v1109_v25 = vunpack.c.l.b16 %v1090_v17 }
 0x3d0   : > { %v1179_v19 = vunpack.c.l.b16 %v1095_v26 }
 0x3d1   : > { %v1111_v43 = vpack.c.b16 %v1109_v25, %v1108_v22 }
 0x3d3   : > { %1700 = vmatmul.msk.bf16.vlgmr.msra.gmra.mxu1 %vm599_vm1, %v1111_v43  ;;  %v1888_v43 = vld [vmem:[%s1997_s17 + $0x8] sm:$0xff] }
 0x3d5   : > { %v1042_v18 = vpop.f32.mrf.mxu3 }
 0x3d6   : > { %v1096_v31 = vpack.c.bf16 %v1042_v18, %v1042_v18 }
 0x3d8   : > { %v1180_v32 = vunpack.c.l.b16 %v1096_v31 }
 0x3da   : > { %v1182_v63 = vpack.c.b16 %v1180_v32, %v1179_v19 }
 0x3dc   : > { %1704 = vmatmul.msk.bf16.vlgmr.msrb.gmra.mxu3 %vm599_vm1, %v1182_v63 }
 0x3fe   : > { %v1080_v11 = vpop.f32.mrf.mxu0 }
 0x3ff   : > { %v1098_v6 = vpack.c.bf16 %v1080_v11, %v1080_v11 }
 0x401   : > { %v1005_v20 = vpop.f32.mrf.mxu2  ;;  %v1214_v24 = vunpack.c.l.b16 %v1098_v6 }
 0x402   : > { %v1094_v23 = vpack.c.bf16 %v1005_v20, %v1005_v20 }
 0x404   : > { %v1146_v28 = vunpack.c.l.b16 %v1094_v23 }
 0x406   : > { %v1148_v29 = vpack.c.b16 %v1146_v28, %v1146_v28  ;;  %v1082_v3 = vpop.f32.mrf.mxu0 }
 0x407   : > { %v1099_v12 = vpack.c.bf16 %v1082_v3, %v1082_v3 }
 0x408   : > { %1703 = vmatmul.msk.bf16.gmra.mxu2 %vm599_vm1, %v1148_v29 }
 0x409   : > { %v1215_v27 = vunpack.c.l.b16 %v1099_v12  ;;  %v1007_v36 = vpop.f32.mrf.mxu2 }
 0x40b   : > { %v1217_v37 = vpack.c.b16 %v1215_v27, %v1214_v24  ;;  %v1889_v24 = vld [vmem:[%s1997_s17 + $0x10] sm:$0x1] }
 0x40d   : > { %1706 = vmatmul.msk.bf16.vlgmr.msrb.gmra.mxu0 %vm599_vm1, %v1217_v37 }
 0x419   : > { %v1045_v38 = vpop.f32.mrf.mxu3 }
 0x41a   : > { %v1097_v39 = vpack.c.bf16 %v1045_v38, %v1045_v38  ;;  %v1904_v38 = vmov 32.0  }
 0x41b   : > { %v965_v40 = vpop.f32.mrf.mxu1  ;;  %1868 = vrcp.f32 %v1904_v38 }
 0x41c   : > { %v1181_v41 = vunpack.c.l.b16 %v1097_v39  ;;  %v1091_v42 = vpack.c.bf16 %v965_v40, %v965_v40 }
 0x41e   : > { %v1183_v16 = vpack.c.b16 %v1181_v41, %v1181_v41  ;;  %v1110_v7 = vunpack.c.l.b16 %v1091_v42 }
 0x420   : > { %v1112_v30 = vpack.c.b16 %v1110_v7, %v1110_v7  ;;  %1705 = vmatmul.msk.bf16.gmra.mxu3 %vm599_vm1, %v1183_v16 }
 0x421   : > { %v1047_v33 = vpop.f32.mrf.mxu3  ;;  %v1869_v39 = vpop.eup %1868 }
 0x422   : > { %1701 = vmatmul.msk.bf16.gmra.mxu1 %vm599_vm1, %v1112_v30  ;;  %v1290_v40 = vmul.f32 32.0, %v1869_v39  ;;  %vm1294_vm7 = vweird.f32 %v1869_v39 }
 0x423   : > { %v967_v46 = vpop.f32.mrf.mxu1  ;;  %v1085_v35 = vpop.f32.mrf.mxu0 }
 0x424   : > { %v1100_v34 = vpack.c.bf16 %v1085_v35, %v1085_v35  ;;  %v1291_v41 = vsub.f32 1.0, %v1290_v40 }
 0x426   : > { %v1216_v47 = vunpack.c.l.b16 %v1100_v34  ;;  %v1292_v42 = vmul.f32 %v1869_v39, %v1291_v41  ;;  %v1763_v41 = vld [vmem:[%s2372_s9 + $0x38] sm:$0xff] }
 0x427   : > { %1508 = vmatpush.bf16.msrb.mxu2 %v1763_v41 }
 0x428   : > { %v1218_v48 = vpack.c.b16 %v1216_v47, %v1216_v47  ;;  %v1293_v16 = vadd.f32 %v1869_v39, %v1292_v42  ;;  %v1762_v42 = vld [vmem:[%s2372_s9 + $0x30] sm:$0xff] }
 0x42a   : > { %1707 = vmatmul.msk.bf16.gmra.mxu0 %vm599_vm1, %v1218_v48  ;;  %v2266_v7 = vsel %vm1294_vm7, %v1869_v39, %v1293_v16  ;;  %v1761_v16 = vld [vmem:[%s2372_s9 + $0x28] sm:$0xff] }
 0x42b   : > { %v1087_v49 = vpop.f32.mrf.mxu0  ;;  %1509 = vmatpush.bf16.msrb.mxu2 %v1762_v42 }
 0x42f   : > { %1510 = vmatpush.bf16.msrb.mxu2 %v1761_v16 }
 0x440   : > { %v1167_v50 = vpop.f32.mrf.mxu2 }
 0x441   : > { %v1247_v56 = vsel %vm467_vm0, %v1167_v50, 0.0 }
 0x448   : > { %v1169_v53 = vpop.f32.mrf.mxu2 }
 0x449   : > { %v1254_v5 = vsel %vm467_vm0, %v1169_v53, 0.0 }
 0x450   : > { %v1132_v51 = vpop.f32.mrf.mxu1 }
 0x451   : > { %v1246_v54 = vsel %vm467_vm0, %v1132_v51, 0.0 }
 0x452   : > { %v1248_v59 = vadd.f32 %v1247_v56, %v1246_v54 }
 0x458   : > { %v1134_v44 = vpop.f32.mrf.mxu1 }
 0x459   : > { %v1253_v4 = vsel %vm467_vm0, %v1134_v44, 0.0  ;;  %v1755_v44 = vld [vmem:[%s2370_s7 + $0x8] sm:$0xff] }
 0x45a   : > { %v1255_v9 = vadd.f32 %v1254_v5, %v1253_v4  ;;  %1399 = vmatpush.bf16.msrb.mxu1 %v1755_v44 }
 0x45f   : > { %v1202_v55 = vpop.f32.mrf.mxu3 }
 0x460   : > { %v1249_v58 = vsel %vm467_vm0, %v1202_v55, 0.0 }
 0x461   : > { %v1250_v52 = vadd.f32 %v1249_v58, %v1248_v59 }
 0x467   : > { %v1204_v0 = vpop.f32.mrf.mxu3 }
 0x468   : > { %v1256_v8 = vsel %vm467_vm0, %v1204_v0, 0.0 }
 0x469   : > { %v1257_v13 = vadd.f32 %v1256_v8, %v1255_v9 }
 0x48a   : > { %v1237_v60 = vpop.f32.mrf.mxu0 }
 0x48b   : > { %v1251_v62 = vsel %vm467_vm0, %v1237_v60, 0.0  ;;  %v1172_v57 = vpop.f32.mrf.mxu2 }
 0x48c   : > { %v1252_v1 = vadd.f32 %v1251_v62, %v1250_v52  ;;  %v1262_v32 = vsel %vm1260_vm6, %v1172_v57, 0.0 }
 0x48e   : > { %v1272_v45 = vadd.f32 %v1813_v61, %v1252_v1 }
 0x490   : > { %v1275_v10 = vadd.f32 %v1272_v45, %v2000_v2 }
 0x492   : > { %v1239_v14 = vpop.f32.mrf.mxu0  ;;  %v1280_v15 = vsel %vm467_vm0, %v1275_v10, 0.0 }
 0x493   : > { %v1258_v17 = vsel %vm467_vm0, %v1239_v14, 0.0  ;;  %v1174_v21 = vpop.f32.mrf.mxu2  ;;  %1281 = vadd.xlane.f32.xlu2 %v1280_v15 }
 0x494   : > { %v1259_v22 = vadd.f32 %v1258_v17, %v1257_v13 }
 0x496   : > { %v1273_v25 = vadd.f32 %v1813_v61, %v1259_v22  ;;  %v1814_v22 = vld [vmem:[%s2368_s5] ss:$0 sm:$0xff] }
 0x498   : > { %v1276_v26 = vadd.f32 %v1888_v43, %v1273_v25 }
 0x49a   : > { %v1283_v18 = vsel %vm467_vm0, %v1276_v26, 0.0 }
 0x49b   : > { %1284 = vadd.xlane.f32.xlu0 %v1283_v18 }
 0x49f   : > { %v1137_v31 = vpop.f32.mrf.mxu1 }
 0x4a0   : > { %v1261_v2 = vsel %vm1260_vm6, %v1137_v31, 0.0 }
 0x4a1   : > { %v1263_v11 = vadd.f32 %v1262_v32, %v1261_v2  ;;  %v1815_v2 = vld [vmem:[%s2369_s6] ss:$0 sm:$0xff] }
 0x4a3   : > { %v1207_v19 = vpop.f32.mrf.mxu3 }
 0x4a4   : > { %v1264_v63 = vsel %vm1260_vm6, %v1207_v19, 0.0 }
 0x4a5   : > { %v1265_v20 = vadd.f32 %v1264_v63, %v1263_v11 }
 0x4a7   : > { %v1139_v23 = vpop.f32.mrf.mxu1  ;;  %v1242_v28 = vpop.f32.mrf.mxu0 }
 0x4a8   : > { %v1266_v6 = vsel %vm1260_vm6, %v1242_v28, 0.0 }
 0x4a9   : > { %v1267_v29 = vadd.f32 %v1266_v6, %v1265_v20 }
 0x4ab   : > { %v1274_v3 = vadd.f32 %v1813_v61, %v1267_v29  ;;  %v1209_v12 = vpop.f32.mrf.mxu3  ;;  %v1754_v61 = vld [vmem:[%s2370_s7] sm:$0xff] }
 0x4ac   : > { %1400 = vmatpush.bf16.msrb.mxu1 %v1754_v61 }
 0x4ad   : > { %v1277_v27 = vadd.f32 %v1889_v24, %v1274_v3 }
 0x4af   : > { %v1244_v36 = vpop.f32.mrf.mxu0  ;;  %v1286_v37 = vsel %vm1260_vm6, %v1277_v27, 0.0 }
 0x4b0   : > { %1287 = vadd.xlane.f32.xlu0 %v1286_v37 }
 0x506   : > { %v1282_v30 = vpop.xlane.xlu2 %1281 }
 0x507   : > { %v1296_v33 = vmul.f32 %v2266_v7, %v1282_v30  ;;  %v1760_v30 = vld [vmem:[%s2372_s9 + $0x20] sm:$0xff] }
 0x508   : > { %1511 = vmatpush.bf16.msrb.mxu2 %v1760_v30 }
 0x509   : > { %v1299_v46 = vsub.f32 %v1275_v10, %v1296_v33  ;;  %v1759_v33 = vld [vmem:[%s2372_s9 + $0x18] sm:$0xff] }
 0x50b   : > { %v1302_v35 = vmul.f32 %v1299_v46, %v1299_v46 }
 0x50c   : > { %1512 = vmatpush.bf16.msrb.mxu2 %v1759_v33 }
 0x50d   : > { %v1305_v34 = vsel %vm467_vm0, %v1302_v35, 0.0  ;;  %v1757_v35 = vld [vmem:[%s2372_s9 + $0x8] sm:$0xff] }
 0x50e   : > { %1306 = vadd.xlane.f32.xlu1 %v1305_v34  ;;  %v1285_v47 = vpop.xlane.xlu0 %1284  ;;  %v1816_v34 = vld [vmem:[%s2371_s8] ss:$0 sm:$0xff] }
 0x50f   : > { %v1297_v48 = vmul.f32 %v2266_v7, %v1285_v47  ;;  %v1756_v47 = vld [vmem:[%s2372_s9] sm:$0xff] }
 0x511   : > { %v1300_v49 = vsub.f32 %v1276_v26, %v1297_v48 }
 0x513   : > { %v1303_v50 = vmul.f32 %v1300_v49, %v1300_v49 }
 0x515   : > { %v1308_v51 = vsel %vm467_vm0, %v1303_v50, 0.0 }
 0x516   : > { %1309 = vadd.xlane.f32.xlu0 %v1308_v51 }
 0x523   : > { %v1288_v55 = vpop.xlane.xlu0 %1287 }
 0x524   : > { %v1298_v53 = vmul.f32 %v2266_v7, %v1288_v55 }
 0x526   : > { %v1301_v54 = vsub.f32 %v1277_v27, %v1298_v53 }
 0x528   : > { %v1304_v56 = vmul.f32 %v1301_v54, %v1301_v54 }
 0x52a   : > { %v1311_v58 = vsel %vm1260_vm6, %v1304_v56, 0.0 }
 0x52b   : > { %1312 = vadd.xlane.f32.xlu1 %v1311_v58 }
 0x581   : > { %v1307_v59 = vpop.xlane.xlu1 %1306 }
 0x582   : > { %v1314_v52 = vmul.f32 %v1307_v59, %v2266_v7 }
 0x584   : > { %v1317_v60 = vadd.f32 1e-05, %v1314_v52 }
 0x586   : > { %1870 = vrsqrt.f32 %v1317_v60  ;;  %vm1326_vm9 = vweird.f32 %v1317_v60 }
 0x589   : > { %v1310_v62 = vpop.xlane.xlu0 %1309 }
 0x58a   : > { %v1315_v57 = vmul.f32 %v1310_v62, %v2266_v7 }
 0x58c   : > { %v1871_v0 = vpop.eup %1870  ;;  %v1318_v1 = vadd.f32 1e-05, %v1315_v57 }
 0x58d   : > { %v1321_v4 = vmul.f32 %v1871_v0, %v1317_v60  ;;  %vm1327_vm8 = vweird.f32 %v1871_v0 }
 0x58e   : > { %1872 = vrsqrt.f32 %v1318_v1  ;;  %vm1328_vm10 = vmor %vm1326_vm9, %vm1327_vm8  ;;  %vm1336_vm12 = vweird.f32 %v1318_v1 }
 0x58f   : > { %v1322_v45 = vmul.f32 %v1871_v0, %v1321_v4 }
 0x591   : > { %v1323_v5 = vmul.f32 0.5, %v1322_v45 }
 0x593   : > { %v1324_v8 = vsub.f32 1.5, %v1323_v5 }
 0x594   : > { %v1873_v9 = vpop.eup %1872 }
 0x595   : > { %v1325_v10 = vmul.f32 %v1871_v0, %v1324_v8  ;;  %v1331_v13 = vmul.f32 %v1873_v9, %v1318_v1  ;;  %vm1337_vm11 = vweird.f32 %v1873_v9 }
 0x596   : > { %vm1338_vm13 = vmor %vm1336_vm12, %vm1337_vm11 }
 0x597   : > { %v1332_v14 = vmul.f32 %v1873_v9, %v1331_v13  ;;  %v1329_v15 = vsel %vm1328_vm10, %v1871_v0, %v1325_v10 }
 0x598   : > { %v1350_v25 = vmul.f32 %v1329_v15, %v1299_v46  ;;  %v1758_v46 = vld [vmem:[%s2372_s9 + $0x10] sm:$0xff] }
 0x599   : > { %v1333_v17 = vmul.f32 0.5, %v1332_v14  ;;  %1513 = vmatpush.bf16.msrb.mxu2 %v1758_v46 }
 0x59a   : > { %v1356_v19 = vmul.f32 %v1814_v22, %v1350_v25 }
 0x59b   : > { %v1334_v21 = vsub.f32 1.5, %v1333_v17 }
 0x59c   : > { %v2289_v20 = vadd.f32 %v1815_v2, %v1356_v19  ;;  %v1817_v19 = vld [vmem:[%s2373_s10] ss:$0 sm:$0xff] }
 0x59d   : > { %v1335_v43 = vmul.f32 %v1873_v9, %v1334_v21  ;;  %1514 = vmatpush.bf16.msrb.mxu2 %v1757_v35 }
 0x59e   : > { %v1313_v26 = vpop.xlane.xlu1 %1312 }
 0x59f   : > { %v1339_v18 = vsel %vm1338_vm13, %v1873_v9, %v1335_v43  ;;  %v1316_v31 = vmul.f32 %v1313_v26, %v2266_v7 }
 0x5a0   : > { %v1351_v32 = vmul.f32 %v1339_v18, %v1300_v49 }
 0x5a1   : > { %v1319_v63 = vadd.f32 1e-05, %v1316_v31  ;;  %1515 = vmatpush.bf16.msrb.mxu2 %v1756_v47 }
 0x5a2   : > { %v1357_v11 = vmul.f32 %v1814_v22, %v1351_v32 }
 0x5a3   : > { %1874 = vrsqrt.f32 %v1319_v63  ;;  %vm1346_vm15 = vweird.f32 %v1319_v63 }
 0x5a4   : > { %v2291_v23 = vadd.f32 %v1815_v2, %v1357_v11 }
 0x5a6   : > { %v1365_v28 = vpack.c.bf16 %v2291_v23, %v2289_v20 }
 0x5a8   : > { %1716 = vmatmul.msk.bf16.vlgmr.msrb.gmra.mxu1 %vm467_vm0, %v1365_v28 }
 0x5a9   : > { %v1875_v6 = vpop.eup %1874 }
 0x5aa   : > { %v1341_v29 = vmul.f32 %v1875_v6, %v1319_v63  ;;  %vm1347_vm14 = vweird.f32 %v1875_v6 }
 0x5ab   : > { %vm1348_vm1 = vmor %vm1346_vm15, %vm1347_vm14 }
 0x5ac   : > { %v1342_v3 = vmul.f32 %v1875_v6, %v1341_v29 }
 0x5ae   : > { %v1343_v12 = vmul.f32 0.5, %v1342_v3 }
 0x5b0   : > { %v1344_v24 = vsub.f32 1.5, %v1343_v12 }
 0x5b2   : > { %v1345_v27 = vmul.f32 %v1875_v6, %v1344_v24 }
 0x5b4   : > { %v1349_v36 = vsel %vm1348_vm1, %v1875_v6, %v1345_v27 }
 0x5b5   : > { %v1352_v37 = vmul.f32 %v1349_v36, %v1301_v54 }
 0x5b7   : > { %v1358_v38 = vmul.f32 %v1814_v22, %v1352_v37 }
 0x5b9   : > { %v2296_v39 = vadd.f32 %v1815_v2, %v1358_v38 }
 0x5bb   : > { %v1366_v40 = vpack.c.bf16 %v2296_v39, %v2296_v39 }
 0x5bd   : > { %1717 = vmatmul.msk.bf16.gmra.mxu1 %vm467_vm0, %v1366_v40 }
 0x625   : > { %v1402_v48 = vpop.f32.mrf.mxu1 }
 0x626   : > { %v1403_v49 = vadd.f32 %v1816_v34, %v1402_v48 }
 0x628   : > { %v1414_v50 = vmul.f32 0.044715, %v1403_v49  ;;  %v1411_v8 = vmul.f32 0.5, %v1403_v49 }
 0x62a   : > { %v1417_v51 = vmul.f32 %v1414_v50, %v1403_v49 }
 0x62c   : > { %v1420_v55 = vmul.f32 %v1417_v51, %v1403_v49 }
 0x62d   : > { %v1404_v53 = vpop.f32.mrf.mxu1 }
 0x62e   : > { %v1423_v54 = vadd.f32 %v1420_v55, %v1403_v49  ;;  %v1405_v56 = vadd.f32 %v1816_v34, %v1404_v53 }
 0x630   : > { %v1415_v58 = vmul.f32 0.044715, %v1405_v56  ;;  %v1426_v59 = vmul.f32 0.7978846, %v1423_v54  ;;  %v1412_v9 = vmul.f32 0.5, %v1405_v56 }
 0x632   : > { %v1418_v44 = vmul.f32 %v1415_v58, %v1405_v56  ;;  %1876 = vtanh.f32 %v1426_v59 }
 0x634   : > { %v1421_v52 = vmul.f32 %v1418_v44, %v1405_v56 }
 0x636   : > { %v1424_v60 = vadd.f32 %v1421_v52, %v1405_v56 }
 0x638   : > { %v1427_v61 = vmul.f32 0.7978846, %v1424_v60  ;;  %v1877_v0 = vpop.eup %1876 }
 0x639   : > { %v1432_v4 = vadd.f32 1.0, %v1877_v0 }
 0x63a   : > { %v1407_v62 = vpop.f32.mrf.mxu1  ;;  %1878 = vtanh.f32 %v1427_v61 }
 0x63b   : > { %v1408_v57 = vadd.f32 %v1816_v34, %v1407_v62  ;;  %v1435_v15 = vmul.f32 %v1432_v4, %v1411_v8 }
 0x63d   : > { %v1416_v1 = vmul.f32 0.044715, %v1408_v57  ;;  %v1413_v18 = vmul.f32 0.5, %v1408_v57 }
 0x63f   : > { %v1419_v45 = vmul.f32 %v1416_v1, %v1408_v57 }
 0x640   : > { %v1879_v5 = vpop.eup %1878 }
 0x641   : > { %v1433_v10 = vadd.f32 1.0, %v1879_v5  ;;  %v1422_v13 = vmul.f32 %v1419_v45, %v1408_v57  ;;  %v1818_v45 = vld [vmem:[%s2374_s11] ss:$0 sm:$0xff] }
 0x642   : > { %v1409_v14 = vpop.f32.mrf.mxu1 }
 0x643   : > { %v1436_v17 = vmul.f32 %v1433_v10, %v1412_v9  ;;  %v1425_v21 = vadd.f32 %v1422_v13, %v1408_v57 }
 0x645   : > { %v1438_v22 = vpack.c.bf16 %v1436_v17, %v1435_v15  ;;  %v1428_v25 = vmul.f32 0.7978846, %v1425_v21 }
 0x647   : > { %1516 = vmatmul.bf16.vlgmr.msrb.gmra.mxu2 %v1438_v22  ;;  %1880 = vtanh.f32 %v1428_v25 }
 0x64d   : > { %v1881_v43 = vpop.eup %1880 }
 0x64e   : > { %v1434_v26 = vadd.f32 1.0, %v1881_v43 }
 0x650   : > { %v1437_v31 = vmul.f32 %v1434_v26, %v1413_v18 }
 0x652   : > { %v1439_v2 = vpack.c.bf16 %v1437_v31, %v1437_v31 }
 0x657   : > { %1521 = vmatmul.bf16.gmra.mxu2 %v1439_v2 }
 0x6ca   : > { %v1517_v32 = vpop.f32.mrf.mxu2 }
 0x6cb   : > { %v1518_v63 = vadd.f32 %v1817_v19, %v1517_v32 }
 0x6cd   : > { %v1526_v11 = vadd.f32 %v1518_v63, %v2289_v20 }
 0x6cf   : > { %v1531_v28 = vsel %vm467_vm0, %v1526_v11, 0.0 }
 0x6d0   : > { %1532 = vadd.xlane.f32.xlu0 %v1531_v28 }
 0x6d2   : > { %v1519_v6 = vpop.f32.mrf.mxu2 }
 0x6d3   : > { %v1520_v29 = vadd.f32 %v1817_v19, %v1519_v6 }
 0x6d5   : > { %v1527_v3 = vadd.f32 %v1520_v29, %v2291_v23 }
 0x6d7   : > { %v1534_v12 = vsel %vm467_vm0, %v1527_v3, 0.0 }
 0x6d8   : > { %1535 = vadd.xlane.f32.xlu1 %v1534_v12 }
 0x6da   : > { %v1522_v24 = vpop.f32.mrf.mxu2 }
 0x6db   : > { %v1523_v27 = vadd.f32 %v1817_v19, %v1522_v24 }
 0x6dd   : > { %v1528_v36 = vadd.f32 %v1523_v27, %v2296_v39 }
 0x6df   : > { %v1537_v37 = vsel %vm1260_vm6, %v1528_v36, 0.0 }
 0x6e0   : > { %1538 = vadd.xlane.f32.xlu0 %v1537_v37 }
 0x6e2   : > { %v1524_v38 = vpop.f32.mrf.mxu2 }
 0x743   : > { %v1533_v40 = vpop.xlane.xlu0 %1532 }
 0x744   : > { %v1540_v20 = vmul.f32 %v1533_v40, %v2266_v7 }
 0x746   : > { %v1543_v41 = vsub.f32 %v1526_v11, %v1540_v20 }
 0x748   : > { %v1546_v42 = vmul.f32 %v1543_v41, %v1543_v41 }
 0x74a   : > { %v1549_v16 = vsel %vm467_vm0, %v1546_v42, 0.0 }
 0x74b   : > { %v1536_v30 = vpop.xlane.xlu1 %1535  ;;  %1550 = vadd.xlane.f32.xlu2 %v1549_v16 }
 0x74c   : > { %v1541_v23 = vmul.f32 %v1536_v30, %v2266_v7 }
 0x74e   : > { %v1544_v33 = vsub.f32 %v1527_v3, %v1541_v23 }
 0x750   : > { %v1547_v46 = vmul.f32 %v1544_v33, %v1544_v33 }
 0x752   : > { %v1552_v35 = vsel %vm467_vm0, %v1547_v46, 0.0 }
 0x753   : > { %1553 = vadd.xlane.f32.xlu1 %v1552_v35  ;;  %v1539_v39 = vpop.xlane.xlu0 %1538 }
 0x754   : > { %v1542_v34 = vmul.f32 %v1539_v39, %v2266_v7 }
 0x756   : > { %v1545_v47 = vsub.f32 %v1528_v36, %v1542_v34 }
 0x758   : > { %v1548_v48 = vmul.f32 %v1545_v47, %v1545_v47 }
 0x75a   : > { %v1555_v49 = vsel %vm1260_vm6, %v1548_v48, 0.0 }
 0x75b   : > { %1556 = vadd.xlane.f32.xlu0 %v1555_v49 }
 0x7be   : > { %v1551_v50 = vpop.xlane.xlu2 %1550 }
 0x7bf   : > { %v1558_v51 = vmul.f32 %v1551_v50, %v2266_v7 }
 0x7c1   : > { %v1561_v55 = vadd.f32 1e-05, %v1558_v51 }
 0x7c3   : > { %1882 = vrsqrt.f32 %v1561_v55  ;;  %vm1570_vm3 = vweird.f32 %v1561_v55 }
 0x7c6   : > { %v1554_v53 = vpop.xlane.xlu1 %1553 }
 0x7c7   : > { %v1559_v54 = vmul.f32 %v1554_v53, %v2266_v7 }
 0x7c9   : > { %v1883_v56 = vpop.eup %1882  ;;  %v1562_v58 = vadd.f32 1e-05, %v1559_v54 }
 0x7ca   : > { %v1565_v59 = vmul.f32 %v1883_v56, %v1561_v55  ;;  %vm1571_vm2 = vweird.f32 %v1883_v56 }
 0x7cb   : > { %1884 = vrsqrt.f32 %v1562_v58  ;;  %vm1572_vm4 = vmor %vm1570_vm3, %vm1571_vm2  ;;  %vm1580_vm7 = vweird.f32 %v1562_v58 }
 0x7cc   : > { %v1566_v44 = vmul.f32 %v1883_v56, %v1565_v59 }
 0x7ce   : > { %v1567_v52 = vmul.f32 0.5, %v1566_v44  ;;  %v1557_v60 = vpop.xlane.xlu0 %1556 }
 0x7cf   : > { %v1560_v61 = vmul.f32 %v1557_v60, %v2266_v7  ;;  %v1819_v7 = vld [vmem:[%s2375_s12] ss:$0 sm:$0xff] }
 0x7d0   : > { %v1568_v62 = vsub.f32 1.5, %v1567_v52 }
 0x7d1   : > { %v1885_v57 = vpop.eup %1884  ;;  %v1563_v0 = vadd.f32 1e-05, %v1560_v61 }
 0x7d2   : > { %v1569_v1 = vmul.f32 %v1883_v56, %v1568_v62  ;;  %v1575_v4 = vmul.f32 %v1885_v57, %v1562_v58  ;;  %vm1581_vm5 = vweird.f32 %v1885_v57 }
 0x7d3   : > { %1886 = vrsqrt.f32 %v1563_v0  ;;  %vm1582_vm8 = vmor %vm1580_vm7, %vm1581_vm5  ;;  %vm1590_vm10 = vweird.f32 %v1563_v0 }
 0x7d4   : > { %v1573_v5 = vsel %vm1572_vm4, %v1883_v56, %v1569_v1  ;;  %v1576_v8 = vmul.f32 %v1885_v57, %v1575_v4 }
 0x7d5   : > { %v1594_v9 = vmul.f32 %v1573_v5, %v1543_v41 }
 0x7d6   : > { %v1577_v10 = vmul.f32 0.5, %v1576_v8 }
 0x7d7   : > { %v1600_v13 = vmul.f32 %v1818_v45, %v1594_v9 }
 0x7d8   : > { %v1578_v14 = vsub.f32 1.5, %v1577_v10 }
 0x7d9   : > { %v1887_v15 = vpop.eup %1886  ;;  %v1606_v17 = vadd.f32 %v1819_v7, %v1600_v13 }
 0x7da   : > { %v1579_v21 = vmul.f32 %v1885_v57, %v1578_v14  ;;  %v1585_v22 = vmul.f32 %v1887_v15, %v1563_v0  ;;  %vm1591_vm9 = vweird.f32 %v1887_v15 }
 0x7db   : > { %1609 = vst.msk [vmem:[%s440_s29] sm:$0xff] %vm467_vm0, %v1606_v17  ;;  %vm1592_vm11 = vmor %vm1590_vm10, %vm1591_vm9 }
 0x7dc   : > { %v1583_v25 = vsel %vm1582_vm8, %v1885_v57, %v1579_v21  ;;  %v1586_v43 = vmul.f32 %v1887_v15, %v1585_v22 }
 0x7dd   : > { %v1595_v26 = vmul.f32 %v1583_v25, %v1544_v33 }
 0x7de   : > { %v1587_v18 = vmul.f32 0.5, %v1586_v43 }
 0x7df   : > { %v1601_v31 = vmul.f32 %v1818_v45, %v1595_v26 }
 0x7e0   : > { %v1588_v2 = vsub.f32 1.5, %v1587_v18 }
 0x7e1   : > { %v1607_v19 = vadd.f32 %v1819_v7, %v1601_v31 }
 0x7e2   : > { %v1589_v32 = vmul.f32 %v1887_v15, %v1588_v2 }
 0x7e3   : > { %1610 = vst.msk [vmem:[%s440_s29 + $0x8] sm:$0xff] %vm467_vm0, %v1607_v19 }
 0x7e4   : > { %v1593_v63 = vsel %vm1592_vm11, %v1887_v15, %v1589_v32 }
 0x7e5   : > { %v1596_v11 = vmul.f32 %v1593_v63, %v1545_v47 }
 0x7e7   : > { %v1602_v28 = vmul.f32 %v1818_v45, %v1596_v11 }
 0x7e9   : > { %v1608_v6 = vadd.f32 %v1819_v7, %v1602_v28 }
 0x7eb   : > { %1611 = vst.msk [vmem:[%s440_s29 + $0x10] sm:$0x1] %vm1260_vm6, %v1608_v6 }
 0x7ec PF: > { %s23_s25 = sadd.s32 1, %s1896_s25  }
 0x7ed   : > { %p20_p4 = scmp.ge.s32.totalorder %s23_s25, 4  }
 0x7ef   :  { %22 = sbr.rel (!%p20_p4) target bundleno = 1 (0x1), region = 102 }

</bundles_post_ra>
